<compile_context>
chip_gen: v7x
topology: tpu7x:2x2x1
jax: 0.10.0
libtpu: 0.0.40
codegen_flags: <defaults>
</compile_context>

<pallas_src>
import functools

import jax
import jax.numpy as jnp
from jax import lax
from jax.experimental import pallas as pl
from jax.experimental.pallas import tpu as pltpu


# ----------------------------------------------------------------------------
# Fused multi-layer GRU kernel (single invocation, no grid).
#
# refs layout (inputs..., outputs..., scratch...):
#   refs[0]                      : emb        (T*B, E)  time-major rows (t*B + b)
#   refs[1 + 4*l + 0]            : w_ih_l     (D_in, 3H)   gate order [r, z, n]
#   refs[1 + 4*l + 1]            : w_hh_l     (H,    3H)
#   refs[1 + 4*l + 2]            : gi_bias_l  (1, 3H)  = b_ih + [b_hh_r, b_hh_z, 0]
#   refs[1 + 4*l + 3]            : b_hh_n_l   (1, H)
#   refs[1 + 4*n_layers]         : out        (B, T, H)
#   refs[2 + 4*n_layers]         : seq scratch VMEM (T*B, H)  (inter-layer buffer)
# ----------------------------------------------------------------------------
def _fused_gru_kernel(n_layers, T, B, H, *refs):
    emb_ref = refs[0]
    out_ref = refs[1 + 4 * n_layers]
    seq_ref = refs[2 + 4 * n_layers]

    x_all = emb_ref[...]                                     # (T*B, D_in)

    for l in range(n_layers):
        w_ih = refs[1 + 4 * l][...]                          # (D_in, 3H)
        w_hh = refs[2 + 4 * l][...]                          # (H, 3H)
        gi_b = refs[3 + 4 * l][...]                          # (1, 3H)
        bhn = refs[4 + 4 * l][...]                           # (1, H)
        last = (l == n_layers - 1)

        # Input projection for ALL timesteps at once (hoisted out of recurrence).
        gi = jnp.dot(x_all, w_ih, preferred_element_type=jnp.float32) + gi_b

        h = jnp.zeros((B, H), jnp.float32)
        for t in range(T):                                   # static, fully unrolled
            gh = jnp.dot(h, w_hh, preferred_element_type=jnp.float32)
            gi_t = gi[t * B:(t + 1) * B]                     # (B, 3H)
            r = jax.nn.sigmoid(gi_t[:, 0:H] + gh[:, 0:H])
            z = jax.nn.sigmoid(gi_t[:, H:2 * H] + gh[:, H:2 * H])
            n = jnp.tanh(gi_t[:, 2 * H:] + r * (gh[:, 2 * H:] + bhn))
            h = (1.0 - z) * n + z * h
            if last:
                # Write batch-major so the projection reads (B, T, H) directly.
                out_ref[:, t:t + 1, :] = h[:, None, :]
            else:
                seq_ref[t * B:(t + 1) * B, :] = h

        if not last:
            x_all = seq_ref[...]                             # (T*B, H) next input


# ----------------------------------------------------------------------------
# Output projection kernel: (B, T, H) @ (H, V) + b, tiled over (batch, vocab).
# ----------------------------------------------------------------------------
def _proj_kernel(h_ref, w_ref, b_ref, o_ref):
    # h_ref: (1, T, H)   w_ref: (H, tV)   b_ref: (1, tV)   o_ref: (1, T, tV)
    h = h_ref[0]
    o_ref[0] = (jnp.dot(h, w_ref[...], preferred_element_type=jnp.float32)
                + b_ref[...])


def proj(hs, w_t, b):
    """hs: (B, T, H) f32, w_t: (H, V), b: (1, V) -> (B, T, V)."""
    B, T, H = hs.shape
    V = w_t.shape[1]
    tV = V
    for cand in (512, 256, 128):
        if V % cand == 0:
            tV = cand
            break
    # TODO(synk): tile H (K axis) with an f32 accumulator for very large hidden.
    cost = pl.CostEstimate(
        flops=2 * B * T * H * V,
        transcendentals=0,
        bytes_accessed=4 * (B * T * H + H * V + V + B * T * V),
    )
    return pl.pallas_call(
        _proj_kernel,
        out_shape=jax.ShapeDtypeStruct((B, T, V), jnp.float32),
        grid=(B, V // tV),
        in_specs=[
            pl.BlockSpec((1, T, H), lambda i, j: (i, 0, 0)),
            pl.BlockSpec((H, tV), lambda i, j: (0, j)),
            pl.BlockSpec((1, tV), lambda i, j: (0, j)),
        ],
        out_specs=pl.BlockSpec((1, T, tV), lambda i, j: (i, 0, j)),
        compiler_params=pltpu.CompilerParams(
            dimension_semantics=("parallel", "parallel")),
        cost_estimate=cost,
    )(hs, w_t, b)


# ----------------------------------------------------------------------------
# Full forward: Embedding -> fused n_layers GRU -> tiled Linear
# ----------------------------------------------------------------------------
def rnnlm_forward(params, x_idx):
    B, T = x_idx.shape
    H = params["gru"][0]["w_hh_t"].shape[0]
    n_layers = len(params["gru"])

    # Embedding gather directly into time-major flattened rows (T*B, E):
    # the transpose is applied to the tiny int32 index array, not activations.
    idx_tm = jnp.transpose(x_idx).reshape(-1)
    emb_2d = jnp.take(params["embed"], idx_tm, axis=0).astype(jnp.float32)

    flat = []
    for lp in params["gru"]:
        b_ih, b_hh = lp["b_ih"], lp["b_hh"]
        # Fold r/z hidden biases into the precomputed input projection bias;
        # the n-gate hidden bias must stay inside the r*(.) term.
        gi_b = b_ih.at[:, :2 * H].add(b_hh[:, :2 * H])
        flat += [lp["w_ih_t"], lp["w_hh_t"], gi_b, b_hh[:, 2 * H:]]

    hs = pl.pallas_call(
        functools.partial(_fused_gru_kernel, n_layers, T, B, H),
        out_shape=jax.ShapeDtypeStruct((B, T, H), jnp.float32),
        scratch_shapes=[pltpu.VMEM((T * B, H), jnp.float32)],
    )(emb_2d, *flat)

    return proj(hs, params["proj_w_t"], params["proj_b"])


# ----------------------------------------------------------------------------
# Pure-JAX reference (PyTorch GRU semantics, unfused biases)
# ----------------------------------------------------------------------------
def rnnlm_reference(params, x_idx):
    B, T = x_idx.shape
    emb = jnp.take(params["embed"], x_idx, axis=0).astype(jnp.float32)  # (B,T,E)
    h = jnp.transpose(emb, (1, 0, 2))                                    # (T,B,E)
    for lp in params["gru"]:
        Hh = lp["w_hh_t"].shape[0]

        def step(h_prev, x_t, lp=lp, Hh=Hh):
            gi = x_t @ lp["w_ih_t"] + lp["b_ih"]
            gh = h_prev @ lp["w_hh_t"] + lp["b_hh"]
            r = jax.nn.sigmoid(gi[:, :Hh] + gh[:, :Hh])
            z = jax.nn.sigmoid(gi[:, Hh:2 * Hh] + gh[:, Hh:2 * Hh])
            n = jnp.tanh(gi[:, 2 * Hh:] + r * gh[:, 2 * Hh:])
            h_new = (1.0 - z) * n + z * h_prev
            return h_new, h_new

        h0 = jnp.zeros((h.shape[1], Hh), jnp.float32)
        _, h = lax.scan(step, h0, h)
    hs = jnp.transpose(h, (1, 0, 2))
    out = hs.reshape(B * T, -1) @ params["proj_w_t"] + params["proj_b"]
    return out.reshape(B, T, -1)


# ----------------------------------------------------------------------------
# Deterministic parameter init (shapes follow torch.nn.Embedding / GRU / Linear)
# ----------------------------------------------------------------------------
def init_params(key, n_vocab, d_embed, d_hidden, n_layers):
    # 1 (embed) + 4 per GRU layer + 2 (proj weight + bias)
    keys = jax.random.split(key, 3 + 4 * n_layers)
    k = iter(keys)
    scale = 1.0 / jnp.sqrt(d_hidden)
    params = {
        "embed": jax.random.normal(next(k), (n_vocab, d_embed), jnp.float32),
        "gru": [],
    }
    for layer in range(n_layers):
        d_in = d_embed if layer == 0 else d_hidden
        # Stored pre-transposed for (x @ W) matmuls; gate order [r, z, n].
        params["gru"].append({
            "w_ih_t": jax.random.uniform(next(k), (d_in, 3 * d_hidden),
                                         jnp.float32, -scale, scale),
            "w_hh_t": jax.random.uniform(next(k), (d_hidden, 3 * d_hidden),
                                         jnp.float32, -scale, scale),
            "b_ih": jax.random.uniform(next(k), (1, 3 * d_hidden),
                                       jnp.float32, -scale, scale),
            "b_hh": jax.random.uniform(next(k), (1, 3 * d_hidden),
                                       jnp.float32, -scale, scale),
        })
    params["proj_w_t"] = jax.random.uniform(next(k), (d_hidden, n_vocab),
                                            jnp.float32, -scale, scale)
    params["proj_b"] = jax.random.uniform(next(k), (1, n_vocab),
                                          jnp.float32, -scale, scale)
    return params


if __name__ == "__main__":
    n_vocab, d_embed, d_hidden, n_layers = 128, 32, 32, 2
    B, T = 2, 8

    key = jax.random.PRNGKey(0)
    pkey, xkey = jax.random.split(key)
    params = init_params(pkey, n_vocab, d_embed, d_hidden, n_layers)
    x = jax.random.randint(xkey, (B, T), 0, n_vocab, dtype=jnp.int32)

    out = jax.block_until_ready(rnnlm_forward(params, x))
    ref = jax.block_until_ready(rnnlm_reference(params, x))

    assert out.shape == (B, T, n_vocab), out.shape
    assert jnp.allclose(out, ref, atol=1e-4, rtol=1e-4), \
        float(jnp.max(jnp.abs(out - ref)))
    print("KERNEL_OK")
</pallas_src>

<mosaic_0001>
module attributes {stable_mosaic.version = 11 : i64} {
  func.func @_fused_gru_kernel(%arg0: memref<16x32xf32, #tpu.memory_space<vmem>>, %arg1: memref<32x96xf32, #tpu.memory_space<vmem>>, %arg2: memref<32x96xf32, #tpu.memory_space<vmem>>, %arg3: memref<1x96xf32, #tpu.memory_space<vmem>>, %arg4: memref<1x32xf32, #tpu.memory_space<vmem>>, %arg5: memref<32x96xf32, #tpu.memory_space<vmem>>, %arg6: memref<32x96xf32, #tpu.memory_space<vmem>>, %arg7: memref<1x96xf32, #tpu.memory_space<vmem>>, %arg8: memref<1x32xf32, #tpu.memory_space<vmem>>, %arg9: memref<2x8x32xf32, #tpu.memory_space<vmem>>, %arg10: memref<16x32xf32, #tpu.memory_space<vmem>>) attributes {dimension_semantics = [], scalar_prefetch = 0 : i64, scratch_operands = 1 : i64, tpu.core_type = #tpu.core_type<tc>} {
    %c0 = arith.constant 0 : index
    %c0_0 = arith.constant 0 : index
    %0 = vector.load %arg0[%c0, %c0_0] : memref<16x32xf32, #tpu.memory_space<vmem>>, vector<16x32xf32>
    %c0_1 = arith.constant 0 : index
    %c0_2 = arith.constant 0 : index
    %1 = vector.load %arg1[%c0_1, %c0_2] : memref<32x96xf32, #tpu.memory_space<vmem>>, vector<32x96xf32>
    %c0_3 = arith.constant 0 : index
    %c0_4 = arith.constant 0 : index
    %2 = vector.load %arg2[%c0_3, %c0_4] : memref<32x96xf32, #tpu.memory_space<vmem>>, vector<32x96xf32>
    %c0_5 = arith.constant 0 : index
    %c0_6 = arith.constant 0 : index
    %3 = vector.load %arg3[%c0_5, %c0_6] : memref<1x96xf32, #tpu.memory_space<vmem>>, vector<1x96xf32>
    %c0_7 = arith.constant 0 : index
    %c0_8 = arith.constant 0 : index
    %4 = vector.load %arg4[%c0_7, %c0_8] : memref<1x32xf32, #tpu.memory_space<vmem>>, vector<1x32xf32>
    %cst = arith.constant dense<0.000000e+00> : vector<16x96xf32>
    %5 = tpu.matmul %0, %1, %cst {dimension_numbers = #tpu.dot_dimension_numbers<[1], [0], [0], [1], [0, 0, 1, 1], [], []>} : vector<16x32xf32>, vector<32x96xf32>, vector<16x96xf32> -> vector<16x96xf32>
    %6 = vector.broadcast %3 : vector<1x96xf32> to vector<16x96xf32>
    %7 = arith.addf %5, %6 : vector<16x96xf32>
    %cst_9 = arith.constant 0.000000e+00 : f32
    %8 = vector.broadcast %cst_9 : f32 to vector<2x32xf32>
    %cst_10 = arith.constant dense<0.000000e+00> : vector<2x96xf32>
    %9 = tpu.matmul %8, %2, %cst_10 {dimension_numbers = #tpu.dot_dimension_numbers<[1], [0], [0], [1], [0, 0, 1, 1], [], []>} : vector<2x32xf32>, vector<32x96xf32>, vector<2x96xf32> -> vector<2x96xf32>
    %10 = vector.extract_strided_slice %7 {offsets = [0, 0], sizes = [2, 96], strides = [1, 1]} : vector<16x96xf32> to vector<2x96xf32>
    %11 = vector.extract_strided_slice %10 {offsets = [0, 0], sizes = [2, 32], strides = [1, 1]} : vector<2x96xf32> to vector<2x32xf32>
    %12 = vector.extract_strided_slice %9 {offsets = [0, 0], sizes = [2, 32], strides = [1, 1]} : vector<2x96xf32> to vector<2x32xf32>
    %13 = arith.addf %11, %12 : vector<2x32xf32>
    %14 = arith.negf %13 : vector<2x32xf32>
    %15 = math.exp %14 : vector<2x32xf32>
    %cst_11 = arith.constant 1.000000e+00 : f32
    %16 = vector.broadcast %cst_11 : f32 to vector<2x32xf32>
    %17 = arith.addf %16, %15 : vector<2x32xf32>
    %18 = arith.divf %16, %17 : vector<2x32xf32>
    %19 = vector.extract_strided_slice %10 {offsets = [0, 32], sizes = [2, 32], strides = [1, 1]} : vector<2x96xf32> to vector<2x32xf32>
    %20 = vector.extract_strided_slice %9 {offsets = [0, 32], sizes = [2, 32], strides = [1, 1]} : vector<2x96xf32> to vector<2x32xf32>
    %21 = arith.addf %19, %20 : vector<2x32xf32>
    %22 = arith.negf %21 : vector<2x32xf32>
    %23 = math.exp %22 : vector<2x32xf32>
    %cst_12 = arith.constant 1.000000e+00 : f32
    %24 = vector.broadcast %cst_12 : f32 to vector<2x32xf32>
    %25 = arith.addf %24, %23 : vector<2x32xf32>
    %26 = arith.divf %24, %25 : vector<2x32xf32>
    %27 = vector.extract_strided_slice %10 {offsets = [0, 64], sizes = [2, 32], strides = [1, 1]} : vector<2x96xf32> to vector<2x32xf32>
    %28 = vector.extract_strided_slice %9 {offsets = [0, 64], sizes = [2, 32], strides = [1, 1]} : vector<2x96xf32> to vector<2x32xf32>
    %29 = vector.broadcast %4 : vector<1x32xf32> to vector<2x32xf32>
    %30 = arith.addf %28, %29 : vector<2x32xf32>
    %31 = arith.mulf %18, %30 : vector<2x32xf32>
    %32 = arith.addf %27, %31 : vector<2x32xf32>
    %33 = math.tanh %32 : vector<2x32xf32>
    %cst_13 = arith.constant 1.000000e+00 : f32
    %34 = vector.broadcast %cst_13 : f32 to vector<2x32xf32>
    %35 = arith.subf %34, %26 : vector<2x32xf32>
    %36 = arith.mulf %35, %33 : vector<2x32xf32>
    %37 = arith.mulf %26, %8 : vector<2x32xf32>
    %38 = arith.addf %36, %37 : vector<2x32xf32>
    %c0_14 = arith.constant 0 : index
    %c0_15 = arith.constant 0 : index
    %39 = vector.load %arg10[%c0_14, %c0_15] : memref<16x32xf32, #tpu.memory_space<vmem>>, vector<2x32xf32>
    tpu.vector_store %arg10[%c0_14, %c0_15], %38 {strides = array<i32>} : memref<16x32xf32, #tpu.memory_space<vmem>>, vector<2x32xf32>,
    %cst_16 = arith.constant dense<0.000000e+00> : vector<2x96xf32>
    %40 = tpu.matmul %38, %2, %cst_16 {dimension_numbers = #tpu.dot_dimension_numbers<[1], [0], [0], [1], [0, 0, 1, 1], [], []>} : vector<2x32xf32>, vector<32x96xf32>, vector<2x96xf32> -> vector<2x96xf32>
    %41 = vector.extract_strided_slice %7 {offsets = [2, 0], sizes = [2, 96], strides = [1, 1]} : vector<16x96xf32> to vector<2x96xf32>
    %42 = vector.extract_strided_slice %41 {offsets = [0, 0], sizes = [2, 32], strides = [1, 1]} : vector<2x96xf32> to vector<2x32xf32>
    %43 = vector.extract_strided_slice %40 {offsets = [0, 0], sizes = [2, 32], strides = [1, 1]} : vector<2x96xf32> to vector<2x32xf32>
    %44 = arith.addf %42, %43 : vector<2x32xf32>
    %45 = arith.negf %44 : vector<2x32xf32>
    %46 = math.exp %45 : vector<2x32xf32>
    %cst_17 = arith.constant 1.000000e+00 : f32
    %47 = vector.broadcast %cst_17 : f32 to vector<2x32xf32>
    %48 = arith.addf %47, %46 : vector<2x32xf32>
    %49 = arith.divf %47, %48 : vector<2x32xf32>
    %50 = vector.extract_strided_slice %41 {offsets = [0, 32], sizes = [2, 32], strides = [1, 1]} : vector<2x96xf32> to vector<2x32xf32>
    %51 = vector.extract_strided_slice %40 {offsets = [0, 32], sizes = [2, 32], strides = [1, 1]} : vector<2x96xf32> to vector<2x32xf32>
    %52 = arith.addf %50, %51 : vector<2x32xf32>
    %53 = arith.negf %52 : vector<2x32xf32>
    %54 = math.exp %53 : vector<2x32xf32>
    %cst_18 = arith.constant 1.000000e+00 : f32
    %55 = vector.broadcast %cst_18 : f32 to vector<2x32xf32>
    %56 = arith.addf %55, %54 : vector<2x32xf32>
    %57 = arith.divf %55, %56 : vector<2x32xf32>
    %58 = vector.extract_strided_slice %41 {offsets = [0, 64], sizes = [2, 32], strides = [1, 1]} : vector<2x96xf32> to vector<2x32xf32>
    %59 = vector.extract_strided_slice %40 {offsets = [0, 64], sizes = [2, 32], strides = [1, 1]} : vector<2x96xf32> to vector<2x32xf32>
    %60 = vector.broadcast %4 : vector<1x32xf32> to vector<2x32xf32>
    %61 = arith.addf %59, %60 : vector<2x32xf32>
    %62 = arith.mulf %49, %61 : vector<2x32xf32>
    %63 = arith.addf %58, %62 : vector<2x32xf32>
    %64 = math.tanh %63 : vector<2x32xf32>
    %cst_19 = arith.constant 1.000000e+00 : f32
    %65 = vector.broadcast %cst_19 : f32 to vector<2x32xf32>
    %66 = arith.subf %65, %57 : vector<2x32xf32>
    %67 = arith.mulf %66, %64 : vector<2x32xf32>
    %68 = arith.mulf %57, %38 : vector<2x32xf32>
    %69 = arith.addf %67, %68 : vector<2x32xf32>
    %c2 = arith.constant 2 : index
    %c0_20 = arith.constant 0 : index
    %70 = vector.load %arg10[%c2, %c0_20] : memref<16x32xf32, #tpu.memory_space<vmem>>, vector<2x32xf32>
    tpu.vector_store %arg10[%c2, %c0_20], %69 {strides = array<i32>} : memref<16x32xf32, #tpu.memory_space<vmem>>, vector<2x32xf32>,
    %cst_21 = arith.constant dense<0.000000e+00> : vector<2x96xf32>
    %71 = tpu.matmul %69, %2, %cst_21 {dimension_numbers = #tpu.dot_dimension_numbers<[1], [0], [0], [1], [0, 0, 1, 1], [], []>} : vector<2x32xf32>, vector<32x96xf32>, vector<2x96xf32> -> vector<2x96xf32>
    %72 = vector.extract_strided_slice %7 {offsets = [4, 0], sizes = [2, 96], strides = [1, 1]} : vector<16x96xf32> to vector<2x96xf32>
    %73 = vector.extract_strided_slice %72 {offsets = [0, 0], sizes = [2, 32], strides = [1, 1]} : vector<2x96xf32> to vector<2x32xf32>
    %74 = vector.extract_strided_slice %71 {offsets = [0, 0], sizes = [2, 32], strides = [1, 1]} : vector<2x96xf32> to vector<2x32xf32>
    %75 = arith.addf %73, %74 : vector<2x32xf32>
    %76 = arith.negf %75 : vector<2x32xf32>
    %77 = math.exp %76 : vector<2x32xf32>
    %cst_22 = arith.constant 1.000000e+00 : f32
    %78 = vector.broadcast %cst_22 : f32 to vector<2x32xf32>
    %79 = arith.addf %78, %77 : vector<2x32xf32>
    %80 = arith.divf %78, %79 : vector<2x32xf32>
    %81 = vector.extract_strided_slice %72 {offsets = [0, 32], sizes = [2, 32], strides = [1, 1]} : vector<2x96xf32> to vector<2x32xf32>
    %82 = vector.extract_strided_slice %71 {offsets = [0, 32], sizes = [2, 32], strides = [1, 1]} : vector<2x96xf32> to vector<2x32xf32>
    %83 = arith.addf %81, %82 : vector<2x32xf32>
    %84 = arith.negf %83 : vector<2x32xf32>
    %85 = math.exp %84 : vector<2x32xf32>
    %cst_23 = arith.constant 1.000000e+00 : f32
    %86 = vector.broadcast %cst_23 : f32 to vector<2x32xf32>
    %87 = arith.addf %86, %85 : vector<2x32xf32>
    %88 = arith.divf %86, %87 : vector<2x32xf32>
    %89 = vector.extract_strided_slice %72 {offsets = [0, 64], sizes = [2, 32], strides = [1, 1]} : vector<2x96xf32> to vector<2x32xf32>
    %90 = vector.extract_strided_slice %71 {offsets = [0, 64], sizes = [2, 32], strides = [1, 1]} : vector<2x96xf32> to vector<2x32xf32>
    %91 = vector.broadcast %4 : vector<1x32xf32> to vector<2x32xf32>
    %92 = arith.addf %90, %91 : vector<2x32xf32>
    %93 = arith.mulf %80, %92 : vector<2x32xf32>
    %94 = arith.addf %89, %93 : vector<2x32xf32>
    %95 = math.tanh %94 : vector<2x32xf32>
    %cst_24 = arith.constant 1.000000e+00 : f32
    %96 = vector.broadcast %cst_24 : f32 to vector<2x32xf32>
    %97 = arith.subf %96, %88 : vector<2x32xf32>
    %98 = arith.mulf %97, %95 : vector<2x32xf32>
    %99 = arith.mulf %88, %69 : vector<2x32xf32>
    %100 = arith.addf %98, %99 : vector<2x32xf32>
    %c4 = arith.constant 4 : index
    %c0_25 = arith.constant 0 : index
    %101 = vector.load %arg10[%c4, %c0_25] : memref<16x32xf32, #tpu.memory_space<vmem>>, vector<2x32xf32>
    tpu.vector_store %arg10[%c4, %c0_25], %100 {strides = array<i32>} : memref<16x32xf32, #tpu.memory_space<vmem>>, vector<2x32xf32>,
    %cst_26 = arith.constant dense<0.000000e+00> : vector<2x96xf32>
    %102 = tpu.matmul %100, %2, %cst_26 {dimension_numbers = #tpu.dot_dimension_numbers<[1], [0], [0], [1], [0, 0, 1, 1], [], []>} : vector<2x32xf32>, vector<32x96xf32>, vector<2x96xf32> -> vector<2x96xf32>
    %103 = vector.extract_strided_slice %7 {offsets = [6, 0], sizes = [2, 96], strides = [1, 1]} : vector<16x96xf32> to vector<2x96xf32>
    %104 = vector.extract_strided_slice %103 {offsets = [0, 0], sizes = [2, 32], strides = [1, 1]} : vector<2x96xf32> to vector<2x32xf32>
    %105 = vector.extract_strided_slice %102 {offsets = [0, 0], sizes = [2, 32], strides = [1, 1]} : vector<2x96xf32> to vector<2x32xf32>
    %106 = arith.addf %104, %105 : vector<2x32xf32>
    %107 = arith.negf %106 : vector<2x32xf32>
    %108 = math.exp %107 : vector<2x32xf32>
    %cst_27 = arith.constant 1.000000e+00 : f32
    %109 = vector.broadcast %cst_27 : f32 to vector<2x32xf32>
    %110 = arith.addf %109, %108 : vector<2x32xf32>
    %111 = arith.divf %109, %110 : vector<2x32xf32>
    %112 = vector.extract_strided_slice %103 {offsets = [0, 32], sizes = [2, 32], strides = [1, 1]} : vector<2x96xf32> to vector<2x32xf32>
    %113 = vector.extract_strided_slice %102 {offsets = [0, 32], sizes = [2, 32], strides = [1, 1]} : vector<2x96xf32> to vector<2x32xf32>
    %114 = arith.addf %112, %113 : vector<2x32xf32>
    %115 = arith.negf %114 : vector<2x32xf32>
    %116 = math.exp %115 : vector<2x32xf32>
    %cst_28 = arith.constant 1.000000e+00 : f32
    %117 = vector.broadcast %cst_28 : f32 to vector<2x32xf32>
    %118 = arith.addf %117, %116 : vector<2x32xf32>
    %119 = arith.divf %117, %118 : vector<2x32xf32>
    %120 = vector.extract_strided_slice %103 {offsets = [0, 64], sizes = [2, 32], strides = [1, 1]} : vector<2x96xf32> to vector<2x32xf32>
    %121 = vector.extract_strided_slice %102 {offsets = [0, 64], sizes = [2, 32], strides = [1, 1]} : vector<2x96xf32> to vector<2x32xf32>
    %122 = vector.broadcast %4 : vector<1x32xf32> to vector<2x32xf32>
    %123 = arith.addf %121, %122 : vector<2x32xf32>
    %124 = arith.mulf %111, %123 : vector<2x32xf32>
    %125 = arith.addf %120, %124 : vector<2x32xf32>
    %126 = math.tanh %125 : vector<2x32xf32>
    %cst_29 = arith.constant 1.000000e+00 : f32
    %127 = vector.broadcast %cst_29 : f32 to vector<2x32xf32>
    %128 = arith.subf %127, %119 : vector<2x32xf32>
    %129 = arith.mulf %128, %126 : vector<2x32xf32>
    %130 = arith.mulf %119, %100 : vector<2x32xf32>
    %131 = arith.addf %129, %130 : vector<2x32xf32>
    %c6 = arith.constant 6 : index
    %c0_30 = arith.constant 0 : index
    %132 = vector.load %arg10[%c6, %c0_30] : memref<16x32xf32, #tpu.memory_space<vmem>>, vector<2x32xf32>
    tpu.vector_store %arg10[%c6, %c0_30], %131 {strides = array<i32>} : memref<16x32xf32, #tpu.memory_space<vmem>>, vector<2x32xf32>,
    %cst_31 = arith.constant dense<0.000000e+00> : vector<2x96xf32>
    %133 = tpu.matmul %131, %2, %cst_31 {dimension_numbers = #tpu.dot_dimension_numbers<[1], [0], [0], [1], [0, 0, 1, 1], [], []>} : vector<2x32xf32>, vector<32x96xf32>, vector<2x96xf32> -> vector<2x96xf32>
    %134 = vector.extract_strided_slice %7 {offsets = [8, 0], sizes = [2, 96], strides = [1, 1]} : vector<16x96xf32> to vector<2x96xf32>
    %135 = vector.extract_strided_slice %134 {offsets = [0, 0], sizes = [2, 32], strides = [1, 1]} : vector<2x96xf32> to vector<2x32xf32>
    %136 = vector.extract_strided_slice %133 {offsets = [0, 0], sizes = [2, 32], strides = [1, 1]} : vector<2x96xf32> to vector<2x32xf32>
    %137 = arith.addf %135, %136 : vector<2x32xf32>
    %138 = arith.negf %137 : vector<2x32xf32>
    %139 = math.exp %138 : vector<2x32xf32>
    %cst_32 = arith.constant 1.000000e+00 : f32
    %140 = vector.broadcast %cst_32 : f32 to vector<2x32xf32>
    %141 = arith.addf %140, %139 : vector<2x32xf32>
    %142 = arith.divf %140, %141 : vector<2x32xf32>
    %143 = vector.extract_strided_slice %134 {offsets = [0, 32], sizes = [2, 32], strides = [1, 1]} : vector<2x96xf32> to vector<2x32xf32>
    %144 = vector.extract_strided_slice %133 {offsets = [0, 32], sizes = [2, 32], strides = [1, 1]} : vector<2x96xf32> to vector<2x32xf32>
    %145 = arith.addf %143, %144 : vector<2x32xf32>
    %146 = arith.negf %145 : vector<2x32xf32>
    %147 = math.exp %146 : vector<2x32xf32>
    %cst_33 = arith.constant 1.000000e+00 : f32
    %148 = vector.broadcast %cst_33 : f32 to vector<2x32xf32>
    %149 = arith.addf %148, %147 : vector<2x32xf32>
    %150 = arith.divf %148, %149 : vector<2x32xf32>
    %151 = vector.extract_strided_slice %134 {offsets = [0, 64], sizes = [2, 32], strides = [1, 1]} : vector<2x96xf32> to vector<2x32xf32>
    %152 = vector.extract_strided_slice %133 {offsets = [0, 64], sizes = [2, 32], strides = [1, 1]} : vector<2x96xf32> to vector<2x32xf32>
    %153 = vector.broadcast %4 : vector<1x32xf32> to vector<2x32xf32>
    %154 = arith.addf %152, %153 : vector<2x32xf32>
    %155 = arith.mulf %142, %154 : vector<2x32xf32>
    %156 = arith.addf %151, %155 : vector<2x32xf32>
    %157 = math.tanh %156 : vector<2x32xf32>
    %cst_34 = arith.constant 1.000000e+00 : f32
    %158 = vector.broadcast %cst_34 : f32 to vector<2x32xf32>
    %159 = arith.subf %158, %150 : vector<2x32xf32>
    %160 = arith.mulf %159, %157 : vector<2x32xf32>
    %161 = arith.mulf %150, %131 : vector<2x32xf32>
    %162 = arith.addf %160, %161 : vector<2x32xf32>
    %c8 = arith.constant 8 : index
    %c0_35 = arith.constant 0 : index
    %163 = vector.load %arg10[%c8, %c0_35] : memref<16x32xf32, #tpu.memory_space<vmem>>, vector<2x32xf32>
    tpu.vector_store %arg10[%c8, %c0_35], %162 {strides = array<i32>} : memref<16x32xf32, #tpu.memory_space<vmem>>, vector<2x32xf32>,
    %cst_36 = arith.constant dense<0.000000e+00> : vector<2x96xf32>
    %164 = tpu.matmul %162, %2, %cst_36 {dimension_numbers = #tpu.dot_dimension_numbers<[1], [0], [0], [1], [0, 0, 1, 1], [], []>} : vector<2x32xf32>, vector<32x96xf32>, vector<2x96xf32> -> vector<2x96xf32>
    %165 = vector.extract_strided_slice %7 {offsets = [10, 0], sizes = [2, 96], strides = [1, 1]} : vector<16x96xf32> to vector<2x96xf32>
    %166 = vector.extract_strided_slice %165 {offsets = [0, 0], sizes = [2, 32], strides = [1, 1]} : vector<2x96xf32> to vector<2x32xf32>
    %167 = vector.extract_strided_slice %164 {offsets = [0, 0], sizes = [2, 32], strides = [1, 1]} : vector<2x96xf32> to vector<2x32xf32>
    %168 = arith.addf %166, %167 : vector<2x32xf32>
    %169 = arith.negf %168 : vector<2x32xf32>
    %170 = math.exp %169 : vector<2x32xf32>
    %cst_37 = arith.constant 1.000000e+00 : f32
    %171 = vector.broadcast %cst_37 : f32 to vector<2x32xf32>
    %172 = arith.addf %171, %170 : vector<2x32xf32>
    %173 = arith.divf %171, %172 : vector<2x32xf32>
    %174 = vector.extract_strided_slice %165 {offsets = [0, 32], sizes = [2, 32], strides = [1, 1]} : vector<2x96xf32> to vector<2x32xf32>
    %175 = vector.extract_strided_slice %164 {offsets = [0, 32], sizes = [2, 32], strides = [1, 1]} : vector<2x96xf32> to vector<2x32xf32>
    %176 = arith.addf %174, %175 : vector<2x32xf32>
    %177 = arith.negf %176 : vector<2x32xf32>
    %178 = math.exp %177 : vector<2x32xf32>
    %cst_38 = arith.constant 1.000000e+00 : f32
    %179 = vector.broadcast %cst_38 : f32 to vector<2x32xf32>
    %180 = arith.addf %179, %178 : vector<2x32xf32>
    %181 = arith.divf %179, %180 : vector<2x32xf32>
    %182 = vector.extract_strided_slice %165 {offsets = [0, 64], sizes = [2, 32], strides = [1, 1]} : vector<2x96xf32> to vector<2x32xf32>
    %183 = vector.extract_strided_slice %164 {offsets = [0, 64], sizes = [2, 32], strides = [1, 1]} : vector<2x96xf32> to vector<2x32xf32>
    %184 = vector.broadcast %4 : vector<1x32xf32> to vector<2x32xf32>
    %185 = arith.addf %183, %184 : vector<2x32xf32>
    %186 = arith.mulf %173, %185 : vector<2x32xf32>
    %187 = arith.addf %182, %186 : vector<2x32xf32>
    %188 = math.tanh %187 : vector<2x32xf32>
    %cst_39 = arith.constant 1.000000e+00 : f32
    %189 = vector.broadcast %cst_39 : f32 to vector<2x32xf32>
    %190 = arith.subf %189, %181 : vector<2x32xf32>
    %191 = arith.mulf %190, %188 : vector<2x32xf32>
    %192 = arith.mulf %181, %162 : vector<2x32xf32>
    %193 = arith.addf %191, %192 : vector<2x32xf32>
    %c10 = arith.constant 10 : index
    %c0_40 = arith.constant 0 : index
    %194 = vector.load %arg10[%c10, %c0_40] : memref<16x32xf32, #tpu.memory_space<vmem>>, vector<2x32xf32>
    tpu.vector_store %arg10[%c10, %c0_40], %193 {strides = array<i32>} : memref<16x32xf32, #tpu.memory_space<vmem>>, vector<2x32xf32>,
    %cst_41 = arith.constant dense<0.000000e+00> : vector<2x96xf32>
    %195 = tpu.matmul %193, %2, %cst_41 {dimension_numbers = #tpu.dot_dimension_numbers<[1], [0], [0], [1], [0, 0, 1, 1], [], []>} : vector<2x32xf32>, vector<32x96xf32>, vector<2x96xf32> -> vector<2x96xf32>
    %196 = vector.extract_strided_slice %7 {offsets = [12, 0], sizes = [2, 96], strides = [1, 1]} : vector<16x96xf32> to vector<2x96xf32>
    %197 = vector.extract_strided_slice %196 {offsets = [0, 0], sizes = [2, 32], strides = [1, 1]} : vector<2x96xf32> to vector<2x32xf32>
    %198 = vector.extract_strided_slice %195 {offsets = [0, 0], sizes = [2, 32], strides = [1, 1]} : vector<2x96xf32> to vector<2x32xf32>
    %199 = arith.addf %197, %198 : vector<2x32xf32>
    %200 = arith.negf %199 : vector<2x32xf32>
    %201 = math.exp %200 : vector<2x32xf32>
    %cst_42 = arith.constant 1.000000e+00 : f32
    %202 = vector.broadcast %cst_42 : f32 to vector<2x32xf32>
    %203 = arith.addf %202, %201 : vector<2x32xf32>
    %204 = arith.divf %202, %203 : vector<2x32xf32>
    %205 = vector.extract_strided_slice %196 {offsets = [0, 32], sizes = [2, 32], strides = [1, 1]} : vector<2x96xf32> to vector<2x32xf32>
    %206 = vector.extract_strided_slice %195 {offsets = [0, 32], sizes = [2, 32], strides = [1, 1]} : vector<2x96xf32> to vector<2x32xf32>
    %207 = arith.addf %205, %206 : vector<2x32xf32>
    %208 = arith.negf %207 : vector<2x32xf32>
    %209 = math.exp %208 : vector<2x32xf32>
    %cst_43 = arith.constant 1.000000e+00 : f32
    %210 = vector.broadcast %cst_43 : f32 to vector<2x32xf32>
    %211 = arith.addf %210, %209 : vector<2x32xf32>
    %212 = arith.divf %210, %211 : vector<2x32xf32>
    %213 = vector.extract_strided_slice %196 {offsets = [0, 64], sizes = [2, 32], strides = [1, 1]} : vector<2x96xf32> to vector<2x32xf32>
    %214 = vector.extract_strided_slice %195 {offsets = [0, 64], sizes = [2, 32], strides = [1, 1]} : vector<2x96xf32> to vector<2x32xf32>
    %215 = vector.broadcast %4 : vector<1x32xf32> to vector<2x32xf32>
    %216 = arith.addf %214, %215 : vector<2x32xf32>
    %217 = arith.mulf %204, %216 : vector<2x32xf32>
    %218 = arith.addf %213, %217 : vector<2x32xf32>
    %219 = math.tanh %218 : vector<2x32xf32>
    %cst_44 = arith.constant 1.000000e+00 : f32
    %220 = vector.broadcast %cst_44 : f32 to vector<2x32xf32>
    %221 = arith.subf %220, %212 : vector<2x32xf32>
    %222 = arith.mulf %221, %219 : vector<2x32xf32>
    %223 = arith.mulf %212, %193 : vector<2x32xf32>
    %224 = arith.addf %222, %223 : vector<2x32xf32>
    %c12 = arith.constant 12 : index
    %c0_45 = arith.constant 0 : index
    %225 = vector.load %arg10[%c12, %c0_45] : memref<16x32xf32, #tpu.memory_space<vmem>>, vector<2x32xf32>
    tpu.vector_store %arg10[%c12, %c0_45], %224 {strides = array<i32>} : memref<16x32xf32, #tpu.memory_space<vmem>>, vector<2x32xf32>,
    %cst_46 = arith.constant dense<0.000000e+00> : vector<2x96xf32>
    %226 = tpu.matmul %224, %2, %cst_46 {dimension_numbers = #tpu.dot_dimension_numbers<[1], [0], [0], [1], [0, 0, 1, 1], [], []>} : vector<2x32xf32>, vector<32x96xf32>, vector<2x96xf32> -> vector<2x96xf32>
    %227 = vector.extract_strided_slice %7 {offsets = [14, 0], sizes = [2, 96], strides = [1, 1]} : vector<16x96xf32> to vector<2x96xf32>
    %228 = vector.extract_strided_slice %227 {offsets = [0, 0], sizes = [2, 32], strides = [1, 1]} : vector<2x96xf32> to vector<2x32xf32>
    %229 = vector.extract_strided_slice %226 {offsets = [0, 0], sizes = [2, 32], strides = [1, 1]} : vector<2x96xf32> to vector<2x32xf32>
    %230 = arith.addf %228, %229 : vector<2x32xf32>
    %231 = arith.negf %230 : vector<2x32xf32>
    %232 = math.exp %231 : vector<2x32xf32>
    %cst_47 = arith.constant 1.000000e+00 : f32
    %233 = vector.broadcast %cst_47 : f32 to vector<2x32xf32>
    %234 = arith.addf %233, %232 : vector<2x32xf32>
    %235 = arith.divf %233, %234 : vector<2x32xf32>
    %236 = vector.extract_strided_slice %227 {offsets = [0, 32], sizes = [2, 32], strides = [1, 1]} : vector<2x96xf32> to vector<2x32xf32>
    %237 = vector.extract_strided_slice %226 {offsets = [0, 32], sizes = [2, 32], strides = [1, 1]} : vector<2x96xf32> to vector<2x32xf32>
    %238 = arith.addf %236, %237 : vector<2x32xf32>
    %239 = arith.negf %238 : vector<2x32xf32>
    %240 = math.exp %239 : vector<2x32xf32>
    %cst_48 = arith.constant 1.000000e+00 : f32
    %241 = vector.broadcast %cst_48 : f32 to vector<2x32xf32>
    %242 = arith.addf %241, %240 : vector<2x32xf32>
    %243 = arith.divf %241, %242 : vector<2x32xf32>
    %244 = vector.extract_strided_slice %227 {offsets = [0, 64], sizes = [2, 32], strides = [1, 1]} : vector<2x96xf32> to vector<2x32xf32>
    %245 = vector.extract_strided_slice %226 {offsets = [0, 64], sizes = [2, 32], strides = [1, 1]} : vector<2x96xf32> to vector<2x32xf32>
    %246 = vector.broadcast %4 : vector<1x32xf32> to vector<2x32xf32>
    %247 = arith.addf %245, %246 : vector<2x32xf32>
    %248 = arith.mulf %235, %247 : vector<2x32xf32>
    %249 = arith.addf %244, %248 : vector<2x32xf32>
    %250 = math.tanh %249 : vector<2x32xf32>
    %cst_49 = arith.constant 1.000000e+00 : f32
    %251 = vector.broadcast %cst_49 : f32 to vector<2x32xf32>
    %252 = arith.subf %251, %243 : vector<2x32xf32>
    %253 = arith.mulf %252, %250 : vector<2x32xf32>
    %254 = arith.mulf %243, %224 : vector<2x32xf32>
    %255 = arith.addf %253, %254 : vector<2x32xf32>
    %c14 = arith.constant 14 : index
    %c0_50 = arith.constant 0 : index
    %256 = vector.load %arg10[%c14, %c0_50] : memref<16x32xf32, #tpu.memory_space<vmem>>, vector<2x32xf32>
    tpu.vector_store %arg10[%c14, %c0_50], %255 {strides = array<i32>} : memref<16x32xf32, #tpu.memory_space<vmem>>, vector<2x32xf32>,
    %c0_51 = arith.constant 0 : index
    %c0_52 = arith.constant 0 : index
    %257 = vector.load %arg10[%c0_51, %c0_52] : memref<16x32xf32, #tpu.memory_space<vmem>>, vector<16x32xf32>
    %c0_53 = arith.constant 0 : index
    %c0_54 = arith.constant 0 : index
    %258 = vector.load %arg5[%c0_53, %c0_54] : memref<32x96xf32, #tpu.memory_space<vmem>>, vector<32x96xf32>
    %c0_55 = arith.constant 0 : index
    %c0_56 = arith.constant 0 : index
    %259 = vector.load %arg6[%c0_55, %c0_56] : memref<32x96xf32, #tpu.memory_space<vmem>>, vector<32x96xf32>
    %c0_57 = arith.constant 0 : index
    %c0_58 = arith.constant 0 : index
    %260 = vector.load %arg7[%c0_57, %c0_58] : memref<1x96xf32, #tpu.memory_space<vmem>>, vector<1x96xf32>
    %c0_59 = arith.constant 0 : index
    %c0_60 = arith.constant 0 : index
    %261 = vector.load %arg8[%c0_59, %c0_60] : memref<1x32xf32, #tpu.memory_space<vmem>>, vector<1x32xf32>
    %cst_61 = arith.constant dense<0.000000e+00> : vector<16x96xf32>
    %262 = tpu.matmul %257, %258, %cst_61 {dimension_numbers = #tpu.dot_dimension_numbers<[1], [0], [0], [1], [0, 0, 1, 1], [], []>} : vector<16x32xf32>, vector<32x96xf32>, vector<16x96xf32> -> vector<16x96xf32>
    %263 = vector.broadcast %260 : vector<1x96xf32> to vector<16x96xf32>
    %264 = arith.addf %262, %263 : vector<16x96xf32>
    %cst_62 = arith.constant 0.000000e+00 : f32
    %265 = vector.broadcast %cst_62 : f32 to vector<2x32xf32>
    %cst_63 = arith.constant dense<0.000000e+00> : vector<2x96xf32>
    %266 = tpu.matmul %265, %259, %cst_63 {dimension_numbers = #tpu.dot_dimension_numbers<[1], [0], [0], [1], [0, 0, 1, 1], [], []>} : vector<2x32xf32>, vector<32x96xf32>, vector<2x96xf32> -> vector<2x96xf32>
    %267 = vector.extract_strided_slice %264 {offsets = [0, 0], sizes = [2, 96], strides = [1, 1]} : vector<16x96xf32> to vector<2x96xf32>
    %268 = vector.extract_strided_slice %267 {offsets = [0, 0], sizes = [2, 32], strides = [1, 1]} : vector<2x96xf32> to vector<2x32xf32>
    %269 = vector.extract_strided_slice %266 {offsets = [0, 0], sizes = [2, 32], strides = [1, 1]} : vector<2x96xf32> to vector<2x32xf32>
    %270 = arith.addf %268, %269 : vector<2x32xf32>
    %271 = arith.negf %270 : vector<2x32xf32>
    %272 = math.exp %271 : vector<2x32xf32>
    %cst_64 = arith.constant 1.000000e+00 : f32
    %273 = vector.broadcast %cst_64 : f32 to vector<2x32xf32>
    %274 = arith.addf %273, %272 : vector<2x32xf32>
    %275 = arith.divf %273, %274 : vector<2x32xf32>
    %276 = vector.extract_strided_slice %267 {offsets = [0, 32], sizes = [2, 32], strides = [1, 1]} : vector<2x96xf32> to vector<2x32xf32>
    %277 = vector.extract_strided_slice %266 {offsets = [0, 32], sizes = [2, 32], strides = [1, 1]} : vector<2x96xf32> to vector<2x32xf32>
    %278 = arith.addf %276, %277 : vector<2x32xf32>
    %279 = arith.negf %278 : vector<2x32xf32>
    %280 = math.exp %279 : vector<2x32xf32>
    %cst_65 = arith.constant 1.000000e+00 : f32
    %281 = vector.broadcast %cst_65 : f32 to vector<2x32xf32>
    %282 = arith.addf %281, %280 : vector<2x32xf32>
    %283 = arith.divf %281, %282 : vector<2x32xf32>
    %284 = vector.extract_strided_slice %267 {offsets = [0, 64], sizes = [2, 32], strides = [1, 1]} : vector<2x96xf32> to vector<2x32xf32>
    %285 = vector.extract_strided_slice %266 {offsets = [0, 64], sizes = [2, 32], strides = [1, 1]} : vector<2x96xf32> to vector<2x32xf32>
    %286 = vector.broadcast %261 : vector<1x32xf32> to vector<2x32xf32>
    %287 = arith.addf %285, %286 : vector<2x32xf32>
    %288 = arith.mulf %275, %287 : vector<2x32xf32>
    %289 = arith.addf %284, %288 : vector<2x32xf32>
    %290 = math.tanh %289 : vector<2x32xf32>
    %cst_66 = arith.constant 1.000000e+00 : f32
    %291 = vector.broadcast %cst_66 : f32 to vector<2x32xf32>
    %292 = arith.subf %291, %283 : vector<2x32xf32>
    %293 = arith.mulf %292, %290 : vector<2x32xf32>
    %294 = arith.mulf %283, %265 : vector<2x32xf32>
    %295 = arith.addf %293, %294 : vector<2x32xf32>
    %296 = vector.shape_cast %295 : vector<2x32xf32> to vector<2x1x32xf32>
    %c0_67 = arith.constant 0 : index
    %c0_68 = arith.constant 0 : index
    %c0_69 = arith.constant 0 : index
    %297 = vector.load %arg9[%c0_67, %c0_68, %c0_69] : memref<2x8x32xf32, #tpu.memory_space<vmem>>, vector<2x1x32xf32>
    tpu.vector_store %arg9[%c0_67, %c0_68, %c0_69], %296 {strides = array<i32>} : memref<2x8x32xf32, #tpu.memory_space<vmem>>, vector<2x1x32xf32>,
    %cst_70 = arith.constant dense<0.000000e+00> : vector<2x96xf32>
    %298 = tpu.matmul %295, %259, %cst_70 {dimension_numbers = #tpu.dot_dimension_numbers<[1], [0], [0], [1], [0, 0, 1, 1], [], []>} : vector<2x32xf32>, vector<32x96xf32>, vector<2x96xf32> -> vector<2x96xf32>
    %299 = vector.extract_strided_slice %264 {offsets = [2, 0], sizes = [2, 96], strides = [1, 1]} : vector<16x96xf32> to vector<2x96xf32>
    %300 = vector.extract_strided_slice %299 {offsets = [0, 0], sizes = [2, 32], strides = [1, 1]} : vector<2x96xf32> to vector<2x32xf32>
    %301 = vector.extract_strided_slice %298 {offsets = [0, 0], sizes = [2, 32], strides = [1, 1]} : vector<2x96xf32> to vector<2x32xf32>
    %302 = arith.addf %300, %301 : vector<2x32xf32>
    %303 = arith.negf %302 : vector<2x32xf32>
    %304 = math.exp %303 : vector<2x32xf32>
    %cst_71 = arith.constant 1.000000e+00 : f32
    %305 = vector.broadcast %cst_71 : f32 to vector<2x32xf32>
    %306 = arith.addf %305, %304 : vector<2x32xf32>
    %307 = arith.divf %305, %306 : vector<2x32xf32>
    %308 = vector.extract_strided_slice %299 {offsets = [0, 32], sizes = [2, 32], strides = [1, 1]} : vector<2x96xf32> to vector<2x32xf32>
    %309 = vector.extract_strided_slice %298 {offsets = [0, 32], sizes = [2, 32], strides = [1, 1]} : vector<2x96xf32> to vector<2x32xf32>
    %310 = arith.addf %308, %309 : vector<2x32xf32>
    %311 = arith.negf %310 : vector<2x32xf32>
    %312 = math.exp %311 : vector<2x32xf32>
    %cst_72 = arith.constant 1.000000e+00 : f32
    %313 = vector.broadcast %cst_72 : f32 to vector<2x32xf32>
    %314 = arith.addf %313, %312 : vector<2x32xf32>
    %315 = arith.divf %313, %314 : vector<2x32xf32>
    %316 = vector.extract_strided_slice %299 {offsets = [0, 64], sizes = [2, 32], strides = [1, 1]} : vector<2x96xf32> to vector<2x32xf32>
    %317 = vector.extract_strided_slice %298 {offsets = [0, 64], sizes = [2, 32], strides = [1, 1]} : vector<2x96xf32> to vector<2x32xf32>
    %318 = vector.broadcast %261 : vector<1x32xf32> to vector<2x32xf32>
    %319 = arith.addf %317, %318 : vector<2x32xf32>
    %320 = arith.mulf %307, %319 : vector<2x32xf32>
    %321 = arith.addf %316, %320 : vector<2x32xf32>
    %322 = math.tanh %321 : vector<2x32xf32>
    %cst_73 = arith.constant 1.000000e+00 : f32
    %323 = vector.broadcast %cst_73 : f32 to vector<2x32xf32>
    %324 = arith.subf %323, %315 : vector<2x32xf32>
    %325 = arith.mulf %324, %322 : vector<2x32xf32>
    %326 = arith.mulf %315, %295 : vector<2x32xf32>
    %327 = arith.addf %325, %326 : vector<2x32xf32>
    %328 = vector.shape_cast %327 : vector<2x32xf32> to vector<2x1x32xf32>
    %c0_74 = arith.constant 0 : index
    %c1 = arith.constant 1 : index
    %c0_75 = arith.constant 0 : index
    %329 = vector.load %arg9[%c0_74, %c1, %c0_75] : memref<2x8x32xf32, #tpu.memory_space<vmem>>, vector<2x1x32xf32>
    tpu.vector_store %arg9[%c0_74, %c1, %c0_75], %328 {strides = array<i32>} : memref<2x8x32xf32, #tpu.memory_space<vmem>>, vector<2x1x32xf32>,
    %cst_76 = arith.constant dense<0.000000e+00> : vector<2x96xf32>
    %330 = tpu.matmul %327, %259, %cst_76 {dimension_numbers = #tpu.dot_dimension_numbers<[1], [0], [0], [1], [0, 0, 1, 1], [], []>} : vector<2x32xf32>, vector<32x96xf32>, vector<2x96xf32> -> vector<2x96xf32>
    %331 = vector.extract_strided_slice %264 {offsets = [4, 0], sizes = [2, 96], strides = [1, 1]} : vector<16x96xf32> to vector<2x96xf32>
    %332 = vector.extract_strided_slice %331 {offsets = [0, 0], sizes = [2, 32], strides = [1, 1]} : vector<2x96xf32> to vector<2x32xf32>
    %333 = vector.extract_strided_slice %330 {offsets = [0, 0], sizes = [2, 32], strides = [1, 1]} : vector<2x96xf32> to vector<2x32xf32>
    %334 = arith.addf %332, %333 : vector<2x32xf32>
    %335 = arith.negf %334 : vector<2x32xf32>
    %336 = math.exp %335 : vector<2x32xf32>
    %cst_77 = arith.constant 1.000000e+00 : f32
    %337 = vector.broadcast %cst_77 : f32 to vector<2x32xf32>
    %338 = arith.addf %337, %336 : vector<2x32xf32>
    %339 = arith.divf %337, %338 : vector<2x32xf32>
    %340 = vector.extract_strided_slice %331 {offsets = [0, 32], sizes = [2, 32], strides = [1, 1]} : vector<2x96xf32> to vector<2x32xf32>
    %341 = vector.extract_strided_slice %330 {offsets = [0, 32], sizes = [2, 32], strides = [1, 1]} : vector<2x96xf32> to vector<2x32xf32>
    %342 = arith.addf %340, %341 : vector<2x32xf32>
    %343 = arith.negf %342 : vector<2x32xf32>
    %344 = math.exp %343 : vector<2x32xf32>
    %cst_78 = arith.constant 1.000000e+00 : f32
    %345 = vector.broadcast %cst_78 : f32 to vector<2x32xf32>
    %346 = arith.addf %345, %344 : vector<2x32xf32>
    %347 = arith.divf %345, %346 : vector<2x32xf32>
    %348 = vector.extract_strided_slice %331 {offsets = [0, 64], sizes = [2, 32], strides = [1, 1]} : vector<2x96xf32> to vector<2x32xf32>
    %349 = vector.extract_strided_slice %330 {offsets = [0, 64], sizes = [2, 32], strides = [1, 1]} : vector<2x96xf32> to vector<2x32xf32>
    %350 = vector.broadcast %261 : vector<1x32xf32> to vector<2x32xf32>
    %351 = arith.addf %349, %350 : vector<2x32xf32>
    %352 = arith.mulf %339, %351 : vector<2x32xf32>
    %353 = arith.addf %348, %352 : vector<2x32xf32>
    %354 = math.tanh %353 : vector<2x32xf32>
    %cst_79 = arith.constant 1.000000e+00 : f32
    %355 = vector.broadcast %cst_79 : f32 to vector<2x32xf32>
    %356 = arith.subf %355, %347 : vector<2x32xf32>
    %357 = arith.mulf %356, %354 : vector<2x32xf32>
    %358 = arith.mulf %347, %327 : vector<2x32xf32>
    %359 = arith.addf %357, %358 : vector<2x32xf32>
    %360 = vector.shape_cast %359 : vector<2x32xf32> to vector<2x1x32xf32>
    %c0_80 = arith.constant 0 : index
    %c2_81 = arith.constant 2 : index
    %c0_82 = arith.constant 0 : index
    %361 = vector.load %arg9[%c0_80, %c2_81, %c0_82] : memref<2x8x32xf32, #tpu.memory_space<vmem>>, vector<2x1x32xf32>
    tpu.vector_store %arg9[%c0_80, %c2_81, %c0_82], %360 {strides = array<i32>} : memref<2x8x32xf32, #tpu.memory_space<vmem>>, vector<2x1x32xf32>,
    %cst_83 = arith.constant dense<0.000000e+00> : vector<2x96xf32>
    %362 = tpu.matmul %359, %259, %cst_83 {dimension_numbers = #tpu.dot_dimension_numbers<[1], [0], [0], [1], [0, 0, 1, 1], [], []>} : vector<2x32xf32>, vector<32x96xf32>, vector<2x96xf32> -> vector<2x96xf32>
    %363 = vector.extract_strided_slice %264 {offsets = [6, 0], sizes = [2, 96], strides = [1, 1]} : vector<16x96xf32> to vector<2x96xf32>
    %364 = vector.extract_strided_slice %363 {offsets = [0, 0], sizes = [2, 32], strides = [1, 1]} : vector<2x96xf32> to vector<2x32xf32>
    %365 = vector.extract_strided_slice %362 {offsets = [0, 0], sizes = [2, 32], strides = [1, 1]} : vector<2x96xf32> to vector<2x32xf32>
    %366 = arith.addf %364, %365 : vector<2x32xf32>
    %367 = arith.negf %366 : vector<2x32xf32>
    %368 = math.exp %367 : vector<2x32xf32>
    %cst_84 = arith.constant 1.000000e+00 : f32
    %369 = vector.broadcast %cst_84 : f32 to vector<2x32xf32>
    %370 = arith.addf %369, %368 : vector<2x32xf32>
    %371 = arith.divf %369, %370 : vector<2x32xf32>
    %372 = vector.extract_strided_slice %363 {offsets = [0, 32], sizes = [2, 32], strides = [1, 1]} : vector<2x96xf32> to vector<2x32xf32>
    %373 = vector.extract_strided_slice %362 {offsets = [0, 32], sizes = [2, 32], strides = [1, 1]} : vector<2x96xf32> to vector<2x32xf32>
    %374 = arith.addf %372, %373 : vector<2x32xf32>
    %375 = arith.negf %374 : vector<2x32xf32>
    %376 = math.exp %375 : vector<2x32xf32>
    %cst_85 = arith.constant 1.000000e+00 : f32
    %377 = vector.broadcast %cst_85 : f32 to vector<2x32xf32>
    %378 = arith.addf %377, %376 : vector<2x32xf32>
    %379 = arith.divf %377, %378 : vector<2x32xf32>
    %380 = vector.extract_strided_slice %363 {offsets = [0, 64], sizes = [2, 32], strides = [1, 1]} : vector<2x96xf32> to vector<2x32xf32>
    %381 = vector.extract_strided_slice %362 {offsets = [0, 64], sizes = [2, 32], strides = [1, 1]} : vector<2x96xf32> to vector<2x32xf32>
    %382 = vector.broadcast %261 : vector<1x32xf32> to vector<2x32xf32>
    %383 = arith.addf %381, %382 : vector<2x32xf32>
    %384 = arith.mulf %371, %383 : vector<2x32xf32>
    %385 = arith.addf %380, %384 : vector<2x32xf32>
    %386 = math.tanh %385 : vector<2x32xf32>
    %cst_86 = arith.constant 1.000000e+00 : f32
    %387 = vector.broadcast %cst_86 : f32 to vector<2x32xf32>
    %388 = arith.subf %387, %379 : vector<2x32xf32>
    %389 = arith.mulf %388, %386 : vector<2x32xf32>
    %390 = arith.mulf %379, %359 : vector<2x32xf32>
    %391 = arith.addf %389, %390 : vector<2x32xf32>
    %392 = vector.shape_cast %391 : vector<2x32xf32> to vector<2x1x32xf32>
    %c0_87 = arith.constant 0 : index
    %c3 = arith.constant 3 : index
    %c0_88 = arith.constant 0 : index
    %393 = vector.load %arg9[%c0_87, %c3, %c0_88] : memref<2x8x32xf32, #tpu.memory_space<vmem>>, vector<2x1x32xf32>
    tpu.vector_store %arg9[%c0_87, %c3, %c0_88], %392 {strides = array<i32>} : memref<2x8x32xf32, #tpu.memory_space<vmem>>, vector<2x1x32xf32>,
    %cst_89 = arith.constant dense<0.000000e+00> : vector<2x96xf32>
    %394 = tpu.matmul %391, %259, %cst_89 {dimension_numbers = #tpu.dot_dimension_numbers<[1], [0], [0], [1], [0, 0, 1, 1], [], []>} : vector<2x32xf32>, vector<32x96xf32>, vector<2x96xf32> -> vector<2x96xf32>
    %395 = vector.extract_strided_slice %264 {offsets = [8, 0], sizes = [2, 96], strides = [1, 1]} : vector<16x96xf32> to vector<2x96xf32>
    %396 = vector.extract_strided_slice %395 {offsets = [0, 0], sizes = [2, 32], strides = [1, 1]} : vector<2x96xf32> to vector<2x32xf32>
    %397 = vector.extract_strided_slice %394 {offsets = [0, 0], sizes = [2, 32], strides = [1, 1]} : vector<2x96xf32> to vector<2x32xf32>
    %398 = arith.addf %396, %397 : vector<2x32xf32>
    %399 = arith.negf %398 : vector<2x32xf32>
    %400 = math.exp %399 : vector<2x32xf32>
    %cst_90 = arith.constant 1.000000e+00 : f32
    %401 = vector.broadcast %cst_90 : f32 to vector<2x32xf32>
    %402 = arith.addf %401, %400 : vector<2x32xf32>
    %403 = arith.divf %401, %402 : vector<2x32xf32>
    %404 = vector.extract_strided_slice %395 {offsets = [0, 32], sizes = [2, 32], strides = [1, 1]} : vector<2x96xf32> to vector<2x32xf32>
    %405 = vector.extract_strided_slice %394 {offsets = [0, 32], sizes = [2, 32], strides = [1, 1]} : vector<2x96xf32> to vector<2x32xf32>
    %406 = arith.addf %404, %405 : vector<2x32xf32>
    %407 = arith.negf %406 : vector<2x32xf32>
    %408 = math.exp %407 : vector<2x32xf32>
    %cst_91 = arith.constant 1.000000e+00 : f32
    %409 = vector.broadcast %cst_91 : f32 to vector<2x32xf32>
    %410 = arith.addf %409, %408 : vector<2x32xf32>
    %411 = arith.divf %409, %410 : vector<2x32xf32>
    %412 = vector.extract_strided_slice %395 {offsets = [0, 64], sizes = [2, 32], strides = [1, 1]} : vector<2x96xf32> to vector<2x32xf32>
    %413 = vector.extract_strided_slice %394 {offsets = [0, 64], sizes = [2, 32], strides = [1, 1]} : vector<2x96xf32> to vector<2x32xf32>
    %414 = vector.broadcast %261 : vector<1x32xf32> to vector<2x32xf32>
    %415 = arith.addf %413, %414 : vector<2x32xf32>
    %416 = arith.mulf %403, %415 : vector<2x32xf32>
    %417 = arith.addf %412, %416 : vector<2x32xf32>
    %418 = math.tanh %417 : vector<2x32xf32>
    %cst_92 = arith.constant 1.000000e+00 : f32
    %419 = vector.broadcast %cst_92 : f32 to vector<2x32xf32>
    %420 = arith.subf %419, %411 : vector<2x32xf32>
    %421 = arith.mulf %420, %418 : vector<2x32xf32>
    %422 = arith.mulf %411, %391 : vector<2x32xf32>
    %423 = arith.addf %421, %422 : vector<2x32xf32>
    %424 = vector.shape_cast %423 : vector<2x32xf32> to vector<2x1x32xf32>
    %c0_93 = arith.constant 0 : index
    %c4_94 = arith.constant 4 : index
    %c0_95 = arith.constant 0 : index
    %425 = vector.load %arg9[%c0_93, %c4_94, %c0_95] : memref<2x8x32xf32, #tpu.memory_space<vmem>>, vector<2x1x32xf32>
    tpu.vector_store %arg9[%c0_93, %c4_94, %c0_95], %424 {strides = array<i32>} : memref<2x8x32xf32, #tpu.memory_space<vmem>>, vector<2x1x32xf32>,
    %cst_96 = arith.constant dense<0.000000e+00> : vector<2x96xf32>
    %426 = tpu.matmul %423, %259, %cst_96 {dimension_numbers = #tpu.dot_dimension_numbers<[1], [0], [0], [1], [0, 0, 1, 1], [], []>} : vector<2x32xf32>, vector<32x96xf32>, vector<2x96xf32> -> vector<2x96xf32>
    %427 = vector.extract_strided_slice %264 {offsets = [10, 0], sizes = [2, 96], strides = [1, 1]} : vector<16x96xf32> to vector<2x96xf32>
    %428 = vector.extract_strided_slice %427 {offsets = [0, 0], sizes = [2, 32], strides = [1, 1]} : vector<2x96xf32> to vector<2x32xf32>
    %429 = vector.extract_strided_slice %426 {offsets = [0, 0], sizes = [2, 32], strides = [1, 1]} : vector<2x96xf32> to vector<2x32xf32>
    %430 = arith.addf %428, %429 : vector<2x32xf32>
    %431 = arith.negf %430 : vector<2x32xf32>
    %432 = math.exp %431 : vector<2x32xf32>
    %cst_97 = arith.constant 1.000000e+00 : f32
    %433 = vector.broadcast %cst_97 : f32 to vector<2x32xf32>
    %434 = arith.addf %433, %432 : vector<2x32xf32>
    %435 = arith.divf %433, %434 : vector<2x32xf32>
    %436 = vector.extract_strided_slice %427 {offsets = [0, 32], sizes = [2, 32], strides = [1, 1]} : vector<2x96xf32> to vector<2x32xf32>
    %437 = vector.extract_strided_slice %426 {offsets = [0, 32], sizes = [2, 32], strides = [1, 1]} : vector<2x96xf32> to vector<2x32xf32>
    %438 = arith.addf %436, %437 : vector<2x32xf32>
    %439 = arith.negf %438 : vector<2x32xf32>
    %440 = math.exp %439 : vector<2x32xf32>
    %cst_98 = arith.constant 1.000000e+00 : f32
    %441 = vector.broadcast %cst_98 : f32 to vector<2x32xf32>
    %442 = arith.addf %441, %440 : vector<2x32xf32>
    %443 = arith.divf %441, %442 : vector<2x32xf32>
    %444 = vector.extract_strided_slice %427 {offsets = [0, 64], sizes = [2, 32], strides = [1, 1]} : vector<2x96xf32> to vector<2x32xf32>
    %445 = vector.extract_strided_slice %426 {offsets = [0, 64], sizes = [2, 32], strides = [1, 1]} : vector<2x96xf32> to vector<2x32xf32>
    %446 = vector.broadcast %261 : vector<1x32xf32> to vector<2x32xf32>
    %447 = arith.addf %445, %446 : vector<2x32xf32>
    %448 = arith.mulf %435, %447 : vector<2x32xf32>
    %449 = arith.addf %444, %448 : vector<2x32xf32>
    %450 = math.tanh %449 : vector<2x32xf32>
    %cst_99 = arith.constant 1.000000e+00 : f32
    %451 = vector.broadcast %cst_99 : f32 to vector<2x32xf32>
    %452 = arith.subf %451, %443 : vector<2x32xf32>
    %453 = arith.mulf %452, %450 : vector<2x32xf32>
    %454 = arith.mulf %443, %423 : vector<2x32xf32>
    %455 = arith.addf %453, %454 : vector<2x32xf32>
    %456 = vector.shape_cast %455 : vector<2x32xf32> to vector<2x1x32xf32>
    %c0_100 = arith.constant 0 : index
    %c5 = arith.constant 5 : index
    %c0_101 = arith.constant 0 : index
    %457 = vector.load %arg9[%c0_100, %c5, %c0_101] : memref<2x8x32xf32, #tpu.memory_space<vmem>>, vector<2x1x32xf32>
    tpu.vector_store %arg9[%c0_100, %c5, %c0_101], %456 {strides = array<i32>} : memref<2x8x32xf32, #tpu.memory_space<vmem>>, vector<2x1x32xf32>,
    %cst_102 = arith.constant dense<0.000000e+00> : vector<2x96xf32>
    %458 = tpu.matmul %455, %259, %cst_102 {dimension_numbers = #tpu.dot_dimension_numbers<[1], [0], [0], [1], [0, 0, 1, 1], [], []>} : vector<2x32xf32>, vector<32x96xf32>, vector<2x96xf32> -> vector<2x96xf32>
    %459 = vector.extract_strided_slice %264 {offsets = [12, 0], sizes = [2, 96], strides = [1, 1]} : vector<16x96xf32> to vector<2x96xf32>
    %460 = vector.extract_strided_slice %459 {offsets = [0, 0], sizes = [2, 32], strides = [1, 1]} : vector<2x96xf32> to vector<2x32xf32>
    %461 = vector.extract_strided_slice %458 {offsets = [0, 0], sizes = [2, 32], strides = [1, 1]} : vector<2x96xf32> to vector<2x32xf32>
    %462 = arith.addf %460, %461 : vector<2x32xf32>
    %463 = arith.negf %462 : vector<2x32xf32>
    %464 = math.exp %463 : vector<2x32xf32>
    %cst_103 = arith.constant 1.000000e+00 : f32
    %465 = vector.broadcast %cst_103 : f32 to vector<2x32xf32>
    %466 = arith.addf %465, %464 : vector<2x32xf32>
    %467 = arith.divf %465, %466 : vector<2x32xf32>
    %468 = vector.extract_strided_slice %459 {offsets = [0, 32], sizes = [2, 32], strides = [1, 1]} : vector<2x96xf32> to vector<2x32xf32>
    %469 = vector.extract_strided_slice %458 {offsets = [0, 32], sizes = [2, 32], strides = [1, 1]} : vector<2x96xf32> to vector<2x32xf32>
    %470 = arith.addf %468, %469 : vector<2x32xf32>
    %471 = arith.negf %470 : vector<2x32xf32>
    %472 = math.exp %471 : vector<2x32xf32>
    %cst_104 = arith.constant 1.000000e+00 : f32
    %473 = vector.broadcast %cst_104 : f32 to vector<2x32xf32>
    %474 = arith.addf %473, %472 : vector<2x32xf32>
    %475 = arith.divf %473, %474 : vector<2x32xf32>
    %476 = vector.extract_strided_slice %459 {offsets = [0, 64], sizes = [2, 32], strides = [1, 1]} : vector<2x96xf32> to vector<2x32xf32>
    %477 = vector.extract_strided_slice %458 {offsets = [0, 64], sizes = [2, 32], strides = [1, 1]} : vector<2x96xf32> to vector<2x32xf32>
    %478 = vector.broadcast %261 : vector<1x32xf32> to vector<2x32xf32>
    %479 = arith.addf %477, %478 : vector<2x32xf32>
    %480 = arith.mulf %467, %479 : vector<2x32xf32>
    %481 = arith.addf %476, %480 : vector<2x32xf32>
    %482 = math.tanh %481 : vector<2x32xf32>
    %cst_105 = arith.constant 1.000000e+00 : f32
    %483 = vector.broadcast %cst_105 : f32 to vector<2x32xf32>
    %484 = arith.subf %483, %475 : vector<2x32xf32>
    %485 = arith.mulf %484, %482 : vector<2x32xf32>
    %486 = arith.mulf %475, %455 : vector<2x32xf32>
    %487 = arith.addf %485, %486 : vector<2x32xf32>
    %488 = vector.shape_cast %487 : vector<2x32xf32> to vector<2x1x32xf32>
    %c0_106 = arith.constant 0 : index
    %c6_107 = arith.constant 6 : index
    %c0_108 = arith.constant 0 : index
    %489 = vector.load %arg9[%c0_106, %c6_107, %c0_108] : memref<2x8x32xf32, #tpu.memory_space<vmem>>, vector<2x1x32xf32>
    tpu.vector_store %arg9[%c0_106, %c6_107, %c0_108], %488 {strides = array<i32>} : memref<2x8x32xf32, #tpu.memory_space<vmem>>, vector<2x1x32xf32>,
    %cst_109 = arith.constant dense<0.000000e+00> : vector<2x96xf32>
    %490 = tpu.matmul %487, %259, %cst_109 {dimension_numbers = #tpu.dot_dimension_numbers<[1], [0], [0], [1], [0, 0, 1, 1], [], []>} : vector<2x32xf32>, vector<32x96xf32>, vector<2x96xf32> -> vector<2x96xf32>
    %491 = vector.extract_strided_slice %264 {offsets = [14, 0], sizes = [2, 96], strides = [1, 1]} : vector<16x96xf32> to vector<2x96xf32>
    %492 = vector.extract_strided_slice %491 {offsets = [0, 0], sizes = [2, 32], strides = [1, 1]} : vector<2x96xf32> to vector<2x32xf32>
    %493 = vector.extract_strided_slice %490 {offsets = [0, 0], sizes = [2, 32], strides = [1, 1]} : vector<2x96xf32> to vector<2x32xf32>
    %494 = arith.addf %492, %493 : vector<2x32xf32>
    %495 = arith.negf %494 : vector<2x32xf32>
    %496 = math.exp %495 : vector<2x32xf32>
    %cst_110 = arith.constant 1.000000e+00 : f32
    %497 = vector.broadcast %cst_110 : f32 to vector<2x32xf32>
    %498 = arith.addf %497, %496 : vector<2x32xf32>
    %499 = arith.divf %497, %498 : vector<2x32xf32>
    %500 = vector.extract_strided_slice %491 {offsets = [0, 32], sizes = [2, 32], strides = [1, 1]} : vector<2x96xf32> to vector<2x32xf32>
    %501 = vector.extract_strided_slice %490 {offsets = [0, 32], sizes = [2, 32], strides = [1, 1]} : vector<2x96xf32> to vector<2x32xf32>
    %502 = arith.addf %500, %501 : vector<2x32xf32>
    %503 = arith.negf %502 : vector<2x32xf32>
    %504 = math.exp %503 : vector<2x32xf32>
    %cst_111 = arith.constant 1.000000e+00 : f32
    %505 = vector.broadcast %cst_111 : f32 to vector<2x32xf32>
    %506 = arith.addf %505, %504 : vector<2x32xf32>
    %507 = arith.divf %505, %506 : vector<2x32xf32>
    %508 = vector.extract_strided_slice %491 {offsets = [0, 64], sizes = [2, 32], strides = [1, 1]} : vector<2x96xf32> to vector<2x32xf32>
    %509 = vector.extract_strided_slice %490 {offsets = [0, 64], sizes = [2, 32], strides = [1, 1]} : vector<2x96xf32> to vector<2x32xf32>
    %510 = vector.broadcast %261 : vector<1x32xf32> to vector<2x32xf32>
    %511 = arith.addf %509, %510 : vector<2x32xf32>
    %512 = arith.mulf %499, %511 : vector<2x32xf32>
    %513 = arith.addf %508, %512 : vector<2x32xf32>
    %514 = math.tanh %513 : vector<2x32xf32>
    %cst_112 = arith.constant 1.000000e+00 : f32
    %515 = vector.broadcast %cst_112 : f32 to vector<2x32xf32>
    %516 = arith.subf %515, %507 : vector<2x32xf32>
    %517 = arith.mulf %516, %514 : vector<2x32xf32>
    %518 = arith.mulf %507, %487 : vector<2x32xf32>
    %519 = arith.addf %517, %518 : vector<2x32xf32>
    %520 = vector.shape_cast %519 : vector<2x32xf32> to vector<2x1x32xf32>
    %c0_113 = arith.constant 0 : index
    %c7 = arith.constant 7 : index
    %c0_114 = arith.constant 0 : index
    %521 = vector.load %arg9[%c0_113, %c7, %c0_114] : memref<2x8x32xf32, #tpu.memory_space<vmem>>, vector<2x1x32xf32>
    tpu.vector_store %arg9[%c0_113, %c7, %c0_114], %520 {strides = array<i32>} : memref<2x8x32xf32, #tpu.memory_space<vmem>>, vector<2x1x32xf32>,
    return
  }
}

</mosaic_0001>

<bundles_post_ra>
// kernel: tpu_custom_call.1
= control target key start
LH: loop header
LB: loop body
LE: loop exit
PB: predicated region body
PF: predicated region fallthrough
CT: control target
= control target key end

     0   :  { %14 = vsyncpa [#allocation4], 0  ;;  %s3669_s0 = inlined_call_operand.hbm [shape: f32[16,32], index: 0, kind: input, shape index: {}]   ;;  %s3670_s1 = inlined_call_operand.hbm [shape: f32[32,96], index: 1, kind: input, shape index: {}]   ;;  %s3671_s2 = inlined_call_operand.hbm [shape: f32[32,96], index: 2, kind: input, shape index: {}]   ;;  %s3672_s3 = inlined_call_operand.vmem [shape: f32[1,96], index: 3, kind: input, shape index: {}]   ;;  %s3673_s4 = inlined_call_operand.vmem [shape: f32[1,32], index: 4, kind: input, shape index: {}]   ;;  %s3674_s5 = inlined_call_operand.hbm [shape: f32[32,96], index: 5, kind: input, shape index: {}]   ;;  %s3675_s6 = inlined_call_operand.hbm [shape: f32[32,96], index: 6, kind: input, shape index: {}]   ;;  %s3676_s7 = inlined_call_operand.vmem [shape: f32[1,96], index: 7, kind: input, shape index: {}]   ;;  %s3677_s8 = inlined_call_operand.vmem [shape: f32[1,32], index: 8, kind: input, shape index: {}]   ;;  %s3678_s9 = inlined_call_operand.hbm [shape: f32[2,8,32], index: 9, kind: output, shape index: {}]  }
   0x1   :  { %15 = vsyncpa [#allocation7], 0 }
   0x2   :  { %16 = vsyncpa [#allocation10], 0 }
   0x3   :  { %17 = vsyncpa [#allocation5], 0  ;;  %s3085_s30 = smov [#allocation6]   ;;  %s3086_s11 = smov [#allocation9]  }
   0x4   :  { %s35_s10 = sshll.u32 %s3085_s30, 4  ;;  %s63_s12 = sshll.u32 %s3086_s11, 4  ;;  %s36_s10 = int_to_ptr.vmem [resolvable:$true] %s35_s10  ;;  %s3149_s12 = int_to_ptr.vmem [resolvable:$true] %s63_s12 }
   0x5   :  { %s2945_s15 = scalar_lea.hbm %s3670_s1, 512 }
   0x6   :  { %p2946_p0 = scmp.ne.s32.totalorder %s3670_s1, %s2945_s15  ;;  %p2949_p1 = scmp.lt.u32.totalorder %s2945_s15, %s3670_s1 }
   0x8   :  { %p2951_p2 = pnand %p2949_p1, %p2946_p0 }
   0xa   :  { %2954 = shalt.err (!%p2951_p2)
}
   0xb   :  { %s2955_s20 = scalar_lea.vmem %s36_s10, 512  ;;  %p2960_p4 = scmp.lt.s32.totalorder %s36_s10, %s36_s10 }
   0xc   :  { %p2956_p3 = scmp.ne.s32.totalorder %s36_s10, %s2955_s20  ;;  %p2961_p5 = scmp.lt.s32.totalorder %s2955_s20, %s2955_s20 }
   0xe   :  { %p2962_p6 = por %p2961_p5, %p2960_p4 }
  0x10   :  { %p2963_p7 = pnand %p2962_p6, %p2956_p3 }
  0x12   :  { %2966 = shalt.err (!%p2963_p7)
}
  0x13   :  { %s3087_s21 = smov 128   ;;  %s3088_s22 = smov 8  }
  0x14   :  { %41 = dma.hbm_to_vmem [thread:$0]  %s3670_s1, 512, %s36_s10, [#allocation7], %s3087_s21, %s3087_s21, %s3088_s22  }
  0x15   :  { %s2967_s27 = scalar_lea.hbm %s3674_s5, 512 }
  0x16   :  { %p2968_p8 = scmp.ne.s32.totalorder %s3674_s5, %s2967_s27  ;;  %p2971_p9 = scmp.lt.u32.totalorder %s2967_s27, %s3674_s5 }
  0x18   :  { %p2973_p10 = pnand %p2971_p9, %p2968_p8 }
  0x1a   :  { %2976 = shalt.err (!%p2973_p10)
}
  0x1b   :  { %s2977_s13 = scalar_lea.vmem %s3149_s12, 512  ;;  %p2982_p12 = scmp.lt.s32.totalorder %s3149_s12, %s3149_s12 }
  0x1c   :  { %p2978_p11 = scmp.ne.s32.totalorder %s3149_s12, %s2977_s13  ;;  %p2983_p13 = scmp.lt.s32.totalorder %s2977_s13, %s2977_s13 }
  0x1e   :  { %p2984_p0 = por %p2983_p13, %p2982_p12 }
  0x20   :  { %p2985_p1 = pnand %p2984_p0, %p2978_p11 }
  0x22   :  { %2988 = shalt.err (!%p2985_p1)
}
  0x23   :  { %69 = dma.hbm_to_vmem [thread:$0]  %s3674_s5, 512, %s3149_s12, [#allocation10], %s3087_s21, %s3087_s21, %s3088_s22  }
  0x24   :  { %s3089_s14 = smov [#allocation3]   ;;  %s3090_s16 = smov [#allocation8]  }
  0x25   :  { %s23_s15 = sshll.u32 %s3089_s14, 4  ;;  %s47_s17 = sshll.u32 %s3090_s16, 4  ;;  %s24_s15 = int_to_ptr.vmem [resolvable:$true] %s23_s15  ;;  %s3186_s17 = int_to_ptr.vmem [resolvable:$true] %s47_s17 }
  0x26   :  { %s2989_s20 = scalar_lea.hbm %s3669_s0, 256 }
  0x27   :  { %p2990_p2 = scmp.ne.s32.totalorder %s3669_s0, %s2989_s20  ;;  %p2993_p3 = scmp.lt.u32.totalorder %s2989_s20, %s3669_s0 }
  0x29   :  { %p2995_p4 = pnand %p2993_p3, %p2990_p2 }
  0x2b   :  { %2998 = shalt.err (!%p2995_p4)
}
  0x2c   :  { %s2999_s5 = scalar_lea.vmem %s24_s15, 256  ;;  %p3004_p6 = scmp.lt.s32.totalorder %s24_s15, %s24_s15 }
  0x2d   :  { %p3000_p5 = scmp.ne.s32.totalorder %s24_s15, %s2999_s5  ;;  %p3005_p7 = scmp.lt.s32.totalorder %s2999_s5, %s2999_s5 }
  0x2f   :  { %p3006_p8 = por %p3005_p7, %p3004_p6 }
  0x31   :  { %p3007_p9 = pnand %p3006_p8, %p3000_p5 }
  0x33   :  { %3010 = shalt.err (!%p3007_p9)
}
  0x34   :  { %29 = dma.hbm_to_vmem [thread:$0]  %s3669_s0, 256, %s24_s15, [#allocation4], %s3087_s21, %s3087_s21, %s3088_s22  }
  0x35   :  { %s3011_s30 = scalar_lea.hbm %s3671_s2, 512 }
  0x36   :  { %p3012_p10 = scmp.ne.s32.totalorder %s3671_s2, %s3011_s30  ;;  %p3015_p11 = scmp.lt.u32.totalorder %s3011_s30, %s3671_s2 }
  0x38   :  { %p3017_p12 = pnand %p3015_p11, %p3012_p10 }
  0x3a   :  { %3020 = shalt.err (!%p3017_p12)
}
  0x3b   :  { %s3021_s14 = scalar_lea.vmem %s3186_s17, 512  ;;  %p3026_p0 = scmp.lt.s32.totalorder %s3186_s17, %s3186_s17 }
  0x3c   :  { %p3022_p13 = scmp.ne.s32.totalorder %s3186_s17, %s3021_s14  ;;  %p3027_p1 = scmp.lt.s32.totalorder %s3021_s14, %s3021_s14 }
  0x3e   :  { %p3028_p2 = por %p3027_p1, %p3026_p0 }
  0x40   :  { %p3029_p3 = pnand %p3028_p2, %p3022_p13 }
  0x42   :  { %3032 = shalt.err (!%p3029_p3)
}
  0x43   :  { %53 = dma.hbm_to_vmem [thread:$0]  %s3671_s2, 512, %s3186_s17, [#allocation7], %s3087_s21, %s3087_s21, %s3088_s22  }
  0x44   :  { %s3091_s16 = smov [#allocation11]   ;;  %s3033_s23 = scalar_lea.hbm %s3675_s6, 512 }
  0x45   :  { %s75_s18 = sshll.u32 %s3091_s16, 4  ;;  %p3034_p4 = scmp.ne.s32.totalorder %s3675_s6, %s3033_s23  ;;  %s76_s18 = int_to_ptr.vmem [resolvable:$true] %s75_s18 }
  0x46   :  { %p3037_p5 = scmp.lt.u32.totalorder %s3033_s23, %s3675_s6 }
  0x48   :  { %p3039_p6 = pnand %p3037_p5, %p3034_p4 }
  0x4a   :  { %3042 = shalt.err (!%p3039_p6)
}
  0x4b   :  { %s3043_s12 = scalar_lea.vmem %s76_s18, 512  ;;  %p3048_p8 = scmp.lt.s32.totalorder %s76_s18, %s76_s18 }
  0x4c   :  { %p3044_p7 = scmp.ne.s32.totalorder %s76_s18, %s3043_s12  ;;  %p3049_p9 = scmp.lt.s32.totalorder %s3043_s12, %s3043_s12 }
  0x4e   :  { %p3050_p10 = por %p3049_p9, %p3048_p8 }
  0x50   :  { %p3051_p11 = pnand %p3050_p10, %p3044_p7 }
  0x52   :  { %3054 = shalt.err (!%p3051_p11)
}
  0x53   :  { %81 = dma.hbm_to_vmem [thread:$0]  %s3675_s6, 512, %s76_s18, [#allocation10], %s3087_s21, %s3087_s21, %s3088_s22  }
  0x54   :  { %3077 = dma.done.wait [#allocation4], 256  }
  0x55   :  { %3078 = vsyncadd [#allocation4], 4294967040 }
  0x56   :  { %3079 = dma.done.wait [#allocation7], 1024  }
  0x57   :  { %3080 = vsyncadd [#allocation7], 4294966272 }
  0x58   :  { %3081 = dma.done.wait [#allocation10], 1024  }
  0x59   :  { %3082 = vsyncadd [#allocation10], 4294966272  ;;  %v3092_v0 = vmov 0.0|0.0   ;;  %vm3093_vm0 = vmmov 0   ;;  %v3094_v1 = vmov 0.0   ;;  %v103_v2 = vld [vmem:[#allocation6] sm:$0xff] }
  0x5a   :  { %2731 = vmatprep.subr.bf16.mxu1 %v3092_v0  ;;  %2544 = vmatprep.mubr.msk.f32.mxu1 %vm3093_vm0, %v3094_v1  ;;  %v104_v3 = vld [vmem:[#allocation6 + $0x8] sm:$0xff]  ;;  %v107_v4 = vld [vmem:[#allocation8] sm:$0xff]  ;;  %vm119_vm1 = vcmask 261120   ;;  %v105_v7 = vld [vmem:[#allocation6 + $0x10] sm:$0xff]  ;;  %s3095_s28 = smov 64   ;;  %vm313_vm2 = vcmask 254976  }
  0x5b   :  { %v2723_v5 = vpack.c.bf16 %v104_v3, %v103_v2  ;;  %v108_v6 = vld [vmem:[#allocation8 + $0x8] sm:$0xff]  ;;  %v106_v8 = vld [vmem:[#allocation6 + $0x18] sm:$0xff]  ;;  %v109_v11 = vld [vmem:[#allocation8 + $0x10] sm:$0xff]  ;;  %vm424_vm3 = vcmask 257026   ;;  %vm652_vm4 = vcmask 261126   ;;  %vm538_vm5 = vcmask 259076  }
  0x5c   :  { %v3241_v9 = vpack.c.bf16 %v108_v6, %v107_v4  ;;  %v2727_v10 = vpack.c.bf16 %v106_v8, %v105_v7  ;;  %v110_v12 = vld [vmem:[#allocation8 + $0x18] sm:$0xff]  ;;  %v101_v13 = vld [vmem:[#allocation3] sm:$0xff]  ;;  %v2399_v14 = vld [vmem:[%s3673_s4] ss:$0 sm:$0xff]  ;;  %vm1339_vm6 = vcmask 253952  }
  0x5d   :  { %2724 = vmatprep.subr.bf16.mxu0 %v2723_v5  ;;  %2533 = vmatprep.mubr.msk.f32.mxu0 %vm119_vm1, %v101_v13  ;;  %v3248_v15 = vpack.c.bf16 %v110_v12, %v109_v11  ;;  %v102_v16 = vld [vmem:[#allocation3 + $0x8] sm:$0xff]  ;;  %v2395_v20 = vld [vmem:[%s3672_s3] ss:$0 sm:$0xff]  ;;  %s3096_s3 = smov 96  }
  0x5e   :  { %2733 = vmatpush3.bf16.msra.mxu1 %v3241_v9  ;;  %2726 = vmatpush3.bf16.msra.mxu0 %v2723_v5 }
  0x5f   :  { %2734 = vmatprep.subr.bf16.mxu1 %v3092_v0  ;;  %2728 = vmatprep.subr.bf16.mxu0 %v2727_v10 }
  0x60   :  { %286 = vrot.lane.b32.xlu0 %v2399_v14, %s3095_s28 }
  0x62   :  { %2736 = vmatpush3.bf16.msra.mxu1 %v3248_v15  ;;  %2730 = vmatpush3.bf16.msra.mxu0 %v2727_v10 }
  0x63   :  { %2737 = vmatprep.subr.bf16.mxu0 %v3092_v0  ;;  %2743 = vmatprep.subr.bf16.mxu1 %v3092_v0 }
  0x65   :  { %2545 = vmatmul.mubr.f32.vlgmr.msra.gmra.mrb[0].mxu1 %v3094_v1  ;;  %2534 = vmatmul.mubr.msk.f32.vlgmr.msra.gmra.mrb[0].mxu0 %vm119_vm1, %v102_v16 }
  0x66   :  { %2739 = vmatpush3.bf16.msra.mxu0 %v3241_v9  ;;  %2555 = vmatprep.mubr.msk.f32.mxu0 %vm3093_vm0, %v3094_v1 }
  0x67   :  { %2740 = vmatprep.subr.bf16.mxu0 %v3092_v0  ;;  %2745 = vmatpush3.bf16.msra.mxu1 %v3241_v9 }
  0x68   :  { %2746 = vmatprep.subr.bf16.mxu1 %v3092_v0  ;;  %2566 = vmatprep.mubr.msk.f32.mxu1 %vm3093_vm0, %v3094_v1 }
  0x6a   :  { %2742 = vmatpush3.bf16.msra.mxu0 %v3248_v15 }
  0x6b   :  { %2748 = vmatpush3.bf16.msra.mxu1 %v3248_v15  ;;  %2749 = vmatprep.subr.bf16.mxu0 %v3092_v0 }
  0x6c   :  { %2755 = vmatprep.subr.bf16.mxu1 %v3092_v0 }
  0xd2   :  { %v3269_v17 = vpop.permute.xlu0 %286 }
 0x138   :  { %v270_v18 = vpop.f32.mrb[0].mxu1  ;;  %v2535_v19 = vpop.f32.mrb[0].mxu0 }
 0x139   :  { %v289_v21 = vadd.f32 %v3269_v17, %v270_v18  ;;  %v3275_v22 = vadd.f32 %v2535_v19, %v2395_v20  ;;  %v2546_v23 = vpop.f32.mrb[1].mxu1  ;;  %v192_v24 = vpop.f32.mrb[1].mxu0 }
 0x13a   :  { %v3278_v25 = vadd.f32 %v2395_v20, %v192_v24 }
 0x13b   :  { %291 = vrot.lane.b32.xlu0 %v289_v21, %s3095_s28 }
 0x13c   :  { %v274_v26 = vadd.f32 %v270_v18, %v3278_v25 }
 0x13e   :  { %v2398_v27 = vmul.f32 -1.442695, %v274_v26 }
 0x140   :  { %2849 = vpow2.f32 %v2398_v27 }
 0x14a   :  { %v2850_v28 = vpop.eup %2849 }
 0x14b   :  { %v278_v29 = vadd.f32 1.0, %v2850_v28 }
 0x14d   :  { %2851 = vrcp.f32 %v278_v29 }
 0x157   :  { %v2852_v30 = vpop.eup %2851 }
 0x158   :  { %v301_v36 = vsub.f32 1.0, %v2852_v30  ;;  %v307_v38 = vmul.f32 0.0, %v2852_v30 }
 0x1ad   :  { %v292_v31 = vpop.permute.xlu0 %291 }
 0x1ae   :  { %v294_v32 = vmul.f32 %v2852_v30, %v292_v31 }
 0x1b0   :  { %296 = vrot.lane.b32.xlu1 %v294_v32, %s3095_s28 }
 0x222   :  { %v297_v33 = vpop.permute.xlu1 %296 }
 0x223   :  { %v299_v34 = vadd.f32 %v297_v33, %v3278_v25 }
 0x225   :  { %2853 = vtanh.f32 %v299_v34 }
 0x22f   :  { %v2854_v35 = vpop.eup %2853 }
 0x230   :  { %303 = vrot.lane.b32.xlu1 %v2854_v35, %s3096_s3 }
 0x2a2   :  { %v304_v37 = vpop.permute.xlu1 %303 }
 0x2a3   :  { %v306_v39 = vmul.f32 %v304_v37, %v301_v36 }
 0x2a5   :  { %v308_v40 = vadd.f32 %v307_v38, %v306_v39 }
 0x2a7   :  { %310 = vrot.lane.b32.xlu0 %v308_v40, %s3096_s3  ;;  %v416_v57 = vrot.slane %v308_v40, 6 }
 0x319   :  { %v311_v41 = vpop.permute.xlu0 %310 }
 0x31a   :  { %314 = vst.msk [vmem:[#allocation2] sm:$0x3] %vm313_vm2, %v311_v41  ;;  %2556 = vmatmul.mubr.msk.f32.vlgmr.msra.gmra.mrb[2].mxu0 %vm119_vm1, %v311_v41 }
 0x31b   :  { %2751 = vmatpush3.bf16.msra.mxu0 %v3241_v9  ;;  %2577 = vmatprep.mubr.msk.f32.mxu0 %vm3093_vm0, %v3094_v1 }
 0x31c   :  { %2752 = vmatprep.subr.bf16.mxu0 %v3092_v0 }
 0x31f   :  { %2754 = vmatpush3.bf16.msra.mxu0 %v3248_v15 }
 0x320   :  { %2761 = vmatprep.subr.bf16.mxu0 %v3092_v0 }
 0x3ed   :  { %v383_v42 = vpop.f32.mrb[2].mxu0 }
 0x3ee   :  { %v397_v43 = vadd.f32 %v383_v42, %v3269_v17  ;;  %v2557_v44 = vpop.f32.mrb[3].mxu0  ;;  %v388_v46 = vrot.slane %v383_v42, 6 }
 0x3f0   :  { %v399_v45 = vrot.slane %v397_v43, 6  ;;  %v390_v47 = vadd.f32 %v388_v46, %v3278_v25 }
 0x3f2   :  { %400 = vrot.lane.b32.xlu1 %v399_v45, %s3095_s28  ;;  %v2401_v48 = vmul.f32 -1.442695, %v390_v47 }
 0x3f4   :  { %2855 = vpow2.f32 %v2401_v48 }
 0x3fe   :  { %v2856_v49 = vpop.eup %2855 }
 0x3ff   :  { %v394_v50 = vadd.f32 1.0, %v2856_v49 }
 0x401   :  { %2857 = vrcp.f32 %v394_v50 }
 0x40b   :  { %v2858_v51 = vpop.eup %2857 }
 0x40c   :  { %v410_v58 = vsub.f32 1.0, %v2858_v51  ;;  %v418_v61 = vmul.f32 %v2858_v51, %v416_v57 }
 0x464   :  { %v401_v52 = vpop.permute.xlu1 %400 }
 0x465   :  { %v403_v53 = vmul.f32 %v2858_v51, %v401_v52 }
 0x467   :  { %405 = vrot.lane.b32.xlu0 %v403_v53, %s3095_s28 }
 0x4d9   :  { %v406_v54 = vpop.permute.xlu0 %405 }
 0x4da   :  { %v408_v55 = vadd.f32 %v406_v54, %v3278_v25 }
 0x4dc   :  { %2859 = vtanh.f32 %v408_v55 }
 0x4e6   :  { %v2860_v56 = vpop.eup %2859 }
 0x4e7   :  { %412 = vrot.lane.b32.xlu1 %v2860_v56, %s3096_s3 }
 0x559   :  { %v413_v59 = vpop.permute.xlu1 %412 }
 0x55a   :  { %v415_v60 = vmul.f32 %v413_v59, %v410_v58 }
 0x55c   :  { %v3299_v62 = vadd.f32 %v418_v61, %v415_v60 }
 0x55e   :  { %v426_v63 = vrot.slane %v3299_v62, 2  ;;  %v530_v23 = vrot.slane %v3299_v62, 6 }
 0x560   :  { %427 = vrot.lane.b32.xlu0 %v426_v63, %s3096_s3 }
 0x5d2   :  { %v428_v2 = vpop.permute.xlu0 %427 }
 0x5d3   :  { %2567 = vmatmul.mubr.msk.f32.vlgmr.msra.gmra.mrb[2].mxu1 %vm119_vm1, %v428_v2 }
 0x5d4   :  { %2757 = vmatpush3.bf16.msra.mxu1 %v3241_v9  ;;  %2588 = vmatprep.mubr.msk.f32.mxu1 %vm3093_vm0, %v3094_v1 }
 0x5d5   :  { %2758 = vmatprep.subr.bf16.mxu1 %v3092_v0 }
 0x5d8   :  { %2760 = vmatpush3.bf16.msra.mxu1 %v3248_v15 }
 0x5d9   :  { %2767 = vmatprep.subr.bf16.mxu1 %v3092_v0 }
 0x6a6   :  { %v497_v3 = vpop.f32.mrb[2].mxu1 }
 0x6a7   :  { %v511_v4 = vadd.f32 %v497_v3, %v3269_v17  ;;  %v2568_v5 = vpop.f32.mrb[3].mxu1  ;;  %v502_v7 = vrot.slane %v497_v3, 4 }
 0x6a9   :  { %v513_v6 = vrot.slane %v511_v4, 4  ;;  %v504_v8 = vadd.f32 %v502_v7, %v3278_v25 }
 0x6ab   :  { %514 = vrot.lane.b32.xlu1 %v513_v6, %s3095_s28  ;;  %v2403_v10 = vmul.f32 -1.442695, %v504_v8 }
 0x6ad   :  { %2861 = vpow2.f32 %v2403_v10 }
 0x6b7   :  { %v2862_v11 = vpop.eup %2861 }
 0x6b8   :  { %v508_v12 = vadd.f32 1.0, %v2862_v11 }
 0x6ba   :  { %2863 = vrcp.f32 %v508_v12 }
 0x6c4   :  { %v2864_v13 = vpop.eup %2863 }
 0x6c5   :  { %v524_v21 = vsub.f32 1.0, %v2864_v13  ;;  %v532_v26 = vmul.f32 %v2864_v13, %v530_v23 }
 0x71d   :  { %v515_v14 = vpop.permute.xlu1 %514 }
 0x71e   :  { %v517_v16 = vmul.f32 %v2864_v13, %v515_v14 }
 0x720   :  { %519 = vrot.lane.b32.xlu0 %v517_v16, %s3095_s28 }
 0x792   :  { %v520_v18 = vpop.permute.xlu0 %519 }
 0x793   :  { %v522_v19 = vadd.f32 %v520_v18, %v3278_v25 }
 0x795   :  { %2865 = vtanh.f32 %v522_v19 }
 0x79f   :  { %v2866_v20 = vpop.eup %2865 }
 0x7a0   :  { %526 = vrot.lane.b32.xlu1 %v2866_v20, %s3096_s3 }
 0x812   :  { %v527_v24 = vpop.permute.xlu1 %526 }
 0x813   :  { %v529_v27 = vmul.f32 %v527_v24, %v524_v21 }
 0x815   :  { %v3317_v28 = vadd.f32 %v532_v26, %v529_v27 }
 0x817   :  { %v540_v29 = vrot.slane %v3317_v28, 4  ;;  %v644_v47 = vrot.slane %v3317_v28, 6 }
 0x819   :  { %541 = vrot.lane.b32.xlu0 %v540_v29, %s3096_s3 }
 0x88b   :  { %v542_v30 = vpop.permute.xlu0 %541 }
 0x88c   :  { %2578 = vmatmul.mubr.msk.f32.vlgmr.msra.gmra.mrb[4].mxu0 %vm119_vm1, %v542_v30 }
 0x88d   :  { %2763 = vmatpush3.bf16.msra.mxu0 %v3241_v9  ;;  %2599 = vmatprep.mubr.msk.f32.mxu0 %vm3093_vm0, %v3094_v1 }
 0x88e   :  { %2764 = vmatprep.subr.bf16.mxu0 %v3092_v0 }
 0x891   :  { %2766 = vmatpush3.bf16.msra.mxu0 %v3248_v15 }
 0x892   :  { %2773 = vmatprep.subr.bf16.mxu0 %v3092_v0 }
 0x95f   :  { %v611_v31 = vpop.f32.mrb[4].mxu0 }
 0x960   :  { %v625_v32 = vadd.f32 %v611_v31, %v3269_v17  ;;  %v2579_v33 = vpop.f32.mrb[5].mxu0  ;;  %v616_v35 = vrot.slane %v611_v31, 2 }
 0x962   :  { %v627_v34 = vrot.slane %v625_v32, 2  ;;  %v618_v36 = vadd.f32 %v616_v35, %v3278_v25 }
 0x964   :  { %628 = vrot.lane.b32.xlu1 %v627_v34, %s3095_s28  ;;  %v2405_v37 = vmul.f32 -1.442695, %v618_v36 }
 0x966   :  { %2867 = vpow2.f32 %v2405_v37 }
 0x970   :  { %v2868_v38 = vpop.eup %2867 }
 0x971   :  { %v622_v39 = vadd.f32 1.0, %v2868_v38 }
 0x973   :  { %2869 = vrcp.f32 %v622_v39 }
 0x97d   :  { %v2870_v40 = vpop.eup %2869 }
 0x97e   :  { %v638_v46 = vsub.f32 1.0, %v2870_v40  ;;  %v646_v49 = vmul.f32 %v2870_v40, %v644_v47 }
 0x9d6   :  { %v629_v41 = vpop.permute.xlu1 %628 }
 0x9d7   :  { %v631_v42 = vmul.f32 %v2870_v40, %v629_v41 }
 0x9d9   :  { %633 = vrot.lane.b32.xlu0 %v631_v42, %s3095_s28 }
 0xa4b   :  { %v634_v43 = vpop.permute.xlu0 %633 }
 0xa4c   :  { %v636_v44 = vadd.f32 %v634_v43, %v3278_v25 }
 0xa4e   :  { %2871 = vtanh.f32 %v636_v44 }
 0xa58   :  { %v2872_v45 = vpop.eup %2871 }
 0xa59   :  { %640 = vrot.lane.b32.xlu1 %v2872_v45, %s3096_s3 }
 0xacb   :  { %v641_v48 = vpop.permute.xlu1 %640 }
 0xacc   :  { %v643_v50 = vmul.f32 %v641_v48, %v638_v46 }
 0xace   :  { %v3335_v51 = vadd.f32 %v646_v49, %v643_v50 }
 0xad0   :  { %v654_v52 = vrot.slane %v3335_v51, 6 }
 0xad2   :  { %655 = vrot.lane.b32.xlu0 %v654_v52, %s3096_s3 }
 0xb44   :  { %v656_v53 = vpop.permute.xlu0 %655 }
 0xb45   :  { %2589 = vmatmul.mubr.msk.f32.vlgmr.msra.gmra.mrb[4].mxu1 %vm119_vm1, %v656_v53 }
 0xb46   :  { %2769 = vmatpush3.bf16.msra.mxu1 %v3241_v9  ;;  %2610 = vmatprep.mubr.msk.f32.mxu1 %vm3093_vm0, %v3094_v1 }
 0xb47   :  { %2770 = vmatprep.subr.bf16.mxu1 %v3092_v0 }
 0xb4a   :  { %2772 = vmatpush3.bf16.msra.mxu1 %v3248_v15 }
 0xc18   :  { %v725_v25 = vpop.f32.mrb[4].mxu1 }
 0xc19   :  { %v736_v54 = vadd.f32 %v725_v25, %v3269_v17  ;;  %v2590_v55 = vpop.f32.mrb[5].mxu1  ;;  %v729_v56 = vadd.f32 %v725_v25, %v3275_v22 }
 0xc1b   :  { %738 = vrot.lane.b32.xlu1 %v736_v54, %s3095_s28  ;;  %v2407_v57 = vmul.f32 -1.442695, %v729_v56 }
 0xc1d   :  { %2873 = vpow2.f32 %v2407_v57 }
 0xc27   :  { %v2874_v58 = vpop.eup %2873 }
 0xc28   :  { %v733_v59 = vadd.f32 1.0, %v2874_v58 }
 0xc2a   :  { %2875 = vrcp.f32 %v733_v59 }
 0xc34   :  { %v2876_v60 = vpop.eup %2875 }
 0xc35   :  { %v748_v5 = vsub.f32 1.0, %v2876_v60  ;;  %v755_v7 = vmul.f32 %v2876_v60, %v654_v52 }
 0xc8d   :  { %v739_v61 = vpop.permute.xlu1 %738 }
 0xc8e   :  { %v741_v63 = vmul.f32 %v2876_v60, %v739_v61 }
 0xc90   :  { %743 = vrot.lane.b32.xlu0 %v741_v63, %s3095_s28 }
 0xd02   :  { %v744_v2 = vpop.permute.xlu0 %743 }
 0xd03   :  { %v746_v3 = vadd.f32 %v744_v2, %v3275_v22 }
 0xd05   :  { %2877 = vtanh.f32 %v746_v3 }
 0xd0f   :  { %v2878_v4 = vpop.eup %2877 }
 0xd10   :  { %750 = vrot.lane.b32.xlu1 %v2878_v4, %s3096_s3 }
 0xd82   :  { %v751_v6 = vpop.permute.xlu1 %750 }
 0xd83   :  { %v753_v8 = vmul.f32 %v751_v6, %v748_v5 }
 0xd85   :  { %v756_v10 = vadd.f32 %v755_v7, %v753_v8 }
 0xd87   :  { %758 = vrot.lane.b32.xlu0 %v756_v10, %s3096_s3  ;;  %v863_v30 = vrot.slane %v756_v10, 6 }
 0xdf9   :  { %v759_v11 = vpop.permute.xlu0 %758 }
 0xdfa   :  { %761 = vst.msk [vmem:[#allocation2 + $0x8] sm:$0x3] %vm313_vm2, %v759_v11  ;;  %2600 = vmatmul.mubr.msk.f32.vlgmr.msra.gmra.mrb[6].mxu0 %vm119_vm1, %v759_v11 }
 0xdfb   :  { %2775 = vmatpush3.bf16.msra.mxu0 %v3241_v9  ;;  %2621 = vmatprep.mubr.msk.f32.mxu0 %vm3093_vm0, %v3094_v1 }
 0xdfc   :  { %2776 = vmatprep.subr.bf16.mxu0 %v3092_v0 }
 0xdff   :  { %2778 = vmatpush3.bf16.msra.mxu0 %v3248_v15 }
 0xe00   :  { %2787 = vmatprep.subr.bf16.mxu0 %v3092_v0 }
 0xecd   :  { %v830_v12 = vpop.f32.mrb[6].mxu0 }
 0xece   :  { %v844_v13 = vadd.f32 %v830_v12, %v3269_v17  ;;  %v2601_v14 = vpop.f32.mrb[7].mxu0  ;;  %v835_v18 = vrot.slane %v830_v12, 6 }
 0xed0   :  { %v846_v16 = vrot.slane %v844_v13, 6  ;;  %v837_v19 = vadd.f32 %v835_v18, %v3275_v22 }
 0xed2   :  { %847 = vrot.lane.b32.xlu1 %v846_v16, %s3095_s28  ;;  %v2409_v9 = vmul.f32 -1.442695, %v837_v19  ;;  %v1105_v19 = vld [vmem:[#allocation11 + $0x8] sm:$0xff] }
 0xed4   :  { %2879 = vpow2.f32 %v2409_v9  ;;  %v1106_v9 = vld [vmem:[#allocation11 + $0x10] sm:$0xff] }
 0xede   :  { %v2880_v20 = vpop.eup %2879 }
 0xedf   :  { %v841_v21 = vadd.f32 1.0, %v2880_v20  ;;  %v1107_v20 = vld [vmem:[#allocation11 + $0x18] sm:$0xff] }
 0xee1   :  { %2881 = vrcp.f32 %v841_v21  ;;  %v3403_v21 = vpack.c.bf16 %v1107_v20, %v1106_v9 }
 0xeeb   :  { %v2882_v23 = vpop.eup %2881 }
 0xeec   :  { %v857_v31 = vsub.f32 1.0, %v2882_v23  ;;  %v865_v34 = vmul.f32 %v2882_v23, %v863_v30 }
 0xf44   :  { %v848_v24 = vpop.permute.xlu1 %847 }
 0xf45   :  { %v850_v15 = vmul.f32 %v2882_v23, %v848_v24  ;;  %v1101_v23 = vld [vmem:[#allocation9 + $0x8] sm:$0xff] }
 0xf47   :  { %852 = vrot.lane.b32.xlu0 %v850_v15, %s3095_s28  ;;  %v1102_v15 = vld [vmem:[#allocation9 + $0x10] sm:$0xff] }
 0xfb9   :  { %v853_v26 = vpop.permute.xlu0 %852 }
 0xfba   :  { %v855_v27 = vadd.f32 %v853_v26, %v3275_v22  ;;  %v1103_v26 = vld [vmem:[#allocation9 + $0x18] sm:$0xff] }
 0xfbc   :  { %2883 = vtanh.f32 %v855_v27  ;;  %v2783_v27 = vpack.c.bf16 %v1103_v26, %v1102_v15 }
 0xfc6   :  { %v2884_v29 = vpop.eup %2883 }
 0xfc7   :  { %859 = vrot.lane.b32.xlu1 %v2884_v29, %s3096_s3 }
0x1039   :  { %v860_v32 = vpop.permute.xlu1 %859 }
0x103a   :  { %v862_v33 = vmul.f32 %v860_v32, %v857_v31  ;;  %v2418_v32 = vld [vmem:[%s3677_s8] ss:$0 sm:$0xff] }
0x103c   :  { %v3366_v35 = vadd.f32 %v865_v34, %v862_v33 }
0x103e   :  { %v872_v36 = vrot.slane %v3366_v35, 2  ;;  %v976_v54 = vrot.slane %v3366_v35, 6 }
0x1040   :  { %873 = vrot.lane.b32.xlu0 %v872_v36, %s3096_s3 }
0x10b2   :  { %v874_v37 = vpop.permute.xlu0 %873 }
0x10b3   :  { %2611 = vmatmul.mubr.msk.f32.vlgmr.msra.gmra.mrb[6].mxu1 %vm119_vm1, %v874_v37 }
0x1186   :  { %v943_v38 = vpop.f32.mrb[6].mxu1 }
0x1187   :  { %v957_v39 = vadd.f32 %v943_v38, %v3269_v17  ;;  %v2612_v40 = vpop.f32.mrb[7].mxu1  ;;  %v948_v42 = vrot.slane %v943_v38, 4 }
0x1189   :  { %v959_v41 = vrot.slane %v957_v39, 4  ;;  %v950_v43 = vadd.f32 %v948_v42, %v3275_v22 }
0x118b   :  { %960 = vrot.lane.b32.xlu1 %v959_v41, %s3095_s28  ;;  %v2411_v44 = vmul.f32 -1.442695, %v950_v43 }
0x118d   :  { %2885 = vpow2.f32 %v2411_v44 }
0x1197   :  { %v2886_v45 = vpop.eup %2885 }
0x1198   :  { %v954_v46 = vadd.f32 1.0, %v2886_v45  ;;  %v2414_v45 = vld [vmem:[%s3676_s7] ss:$0 sm:$0xff]  ;;  %s3098_s7 = smov [#allocation12]  }
0x1199   :  { %s2381_s1 = sshll.u32 %s3098_s7, 4  ;;  %s2382_s1 = int_to_ptr.vmem [resolvable:$true] %s2381_s1 }
0x119a   :  { %2887 = vrcp.f32 %v954_v46  ;;  %s3055_s10 = scalar_lea.vmem %s2382_s1, 256  ;;  %p3060_p13 = scmp.lt.s32.totalorder %s2382_s1, %s2382_s1 }
0x119b   :  { %p3056_p12 = scmp.ne.s32.totalorder %s2382_s1, %s3055_s10  ;;  %p3061_p0 = scmp.lt.s32.totalorder %s3055_s10, %s3055_s10 }
0x119d   :  { %p3062_p1 = por %p3061_p0, %p3060_p13 }
0x119f   :  { %p3063_p2 = pnand %p3062_p1, %p3056_p12 }
0x11a4   :  { %v2888_v47 = vpop.eup %2887 }
0x11a5   :  { %v970_v25 = vsub.f32 1.0, %v2888_v47  ;;  %v978_v56 = vmul.f32 %v2888_v47, %v976_v54 }
0x11fd   :  { %v961_v48 = vpop.permute.xlu1 %960 }
0x11fe   :  { %v963_v49 = vmul.f32 %v2888_v47, %v961_v48 }
0x1200   :  { %965 = vrot.lane.b32.xlu0 %v963_v49, %s3095_s28 }
0x1272   :  { %v966_v50 = vpop.permute.xlu0 %965 }
0x1273   :  { %v968_v52 = vadd.f32 %v966_v50, %v3275_v22 }
0x1275   :  { %2889 = vtanh.f32 %v968_v52 }
0x127f   :  { %v2890_v53 = vpop.eup %2889 }
0x1280   :  { %972 = vrot.lane.b32.xlu1 %v2890_v53, %s3096_s3 }
0x12f2   :  { %v973_v55 = vpop.permute.xlu1 %972 }
0x12f3   :  { %v975_v57 = vmul.f32 %v973_v55, %v970_v25 }
0x12f5   :  { %v3378_v58 = vadd.f32 %v978_v56, %v975_v57 }
0x12f7   :  { %v985_v59 = vrot.slane %v3378_v58, 4  ;;  %v1089_v30 = vrot.slane %v3378_v58, 6 }
0x12f9   :  { %986 = vrot.lane.b32.xlu0 %v985_v59, %s3096_s3 }
0x136b   :  { %v987_v60 = vpop.permute.xlu0 %986 }
0x136c   :  { %2622 = vmatmul.mubr.msk.f32.vlgmr.msra.gmra.mrb[8].mxu0 %vm119_vm1, %v987_v60 }
0x136d   :  { %2643 = vmatprep.mubr.msk.f32.mxu0 %vm3093_vm0, %v3094_v1 }
0x143f   :  { %v1056_v61 = vpop.f32.mrb[8].mxu0 }
0x1440   :  { %v1070_v63 = vadd.f32 %v1056_v61, %v3269_v17  ;;  %v2623_v2 = vpop.f32.mrb[9].mxu0  ;;  %v1061_v4 = vrot.slane %v1056_v61, 2 }
0x1442   :  { %v1072_v3 = vrot.slane %v1070_v63, 2  ;;  %v1063_v5 = vadd.f32 %v1061_v4, %v3275_v22 }
0x1444   :  { %1073 = vrot.lane.b32.xlu1 %v1072_v3, %s3095_s28  ;;  %v2413_v6 = vmul.f32 -1.442695, %v1063_v5 }
0x1446   :  { %2891 = vpow2.f32 %v2413_v6 }
0x1450   :  { %v2892_v7 = vpop.eup %2891 }
0x1451   :  { %v1067_v8 = vadd.f32 1.0, %v2892_v7 }
0x1453   :  { %2893 = vrcp.f32 %v1067_v8 }
0x145d   :  { %v2894_v10 = vpop.eup %2893 }
0x145e   :  { %v1083_v29 = vsub.f32 1.0, %v2894_v10  ;;  %v1091_v33 = vmul.f32 %v2894_v10, %v1089_v30 }
0x14b6   :  { %v1074_v11 = vpop.permute.xlu1 %1073 }
0x14b7   :  { %v1076_v12 = vmul.f32 %v2894_v10, %v1074_v11 }
0x14b9   :  { %1078 = vrot.lane.b32.xlu0 %v1076_v12, %s3095_s28 }
0x14bd   :  { %421 = vrot.lane.b32.xlu0 %v3299_v62, %s3096_s3 }
0x14c1   :  { %649 = vrot.lane.b32.xlu0 %v3335_v51, %s3096_s3  ;;  %v1104_v51 = vld [vmem:[#allocation11] sm:$0xff] }
0x14c5   :  { %981 = vrot.lane.b32.xlu0 %v3378_v58, %s3096_s3 }
0x14c9   :  { %1279 = vrot.lane.b32.xlu0 %v2418_v32, %s3095_s28 }
0x152b   :  { %v1079_v17 = vpop.permute.xlu0 %1078 }
0x152c   :  { %v1081_v13 = vadd.f32 %v1079_v17, %v3275_v22  ;;  %v3400_v22 = vpack.c.bf16 %v1105_v19, %v1104_v51 }
0x152e   :  { %2895 = vtanh.f32 %v1081_v13  ;;  %2789 = vmatpush3.bf16.msra.mxu0 %v3400_v22 }
0x152f   :  { %v422_v14 = vpop.permute.xlu0 %421  ;;  %2790 = vmatprep.subr.bf16.mxu0 %v3092_v0 }
0x1530   :  { %425 = vst.msk [vmem:[#allocation2] sm:$0xc] %vm424_vm3, %v422_v14 }
0x1532   :  { %2792 = vmatpush3.bf16.msra.mxu0 %v3403_v21 }
0x1533   :  { %v650_v16 = vpop.permute.xlu0 %649  ;;  %2799 = vmatprep.subr.bf16.mxu0 %v3092_v0 }
0x1534   :  { %653 = vst.msk [vmem:[#allocation2] sm:$0xc0] %vm652_vm4, %v650_v16 }
0x1535   :  { %2644 = vmatmul.mubr.f32.vlgmr.msra.gmra.mrb[10].mxu0 %v3094_v1 }
0x1536   :  { %2801 = vmatpush3.bf16.msra.mxu0 %v3400_v22  ;;  %2665 = vmatprep.mubr.msk.f32.mxu0 %vm3093_vm0, %v3094_v1 }
0x1537   :  { %v982_v62 = vpop.permute.xlu0 %981  ;;  %2802 = vmatprep.subr.bf16.mxu0 %v3092_v0 }
0x1538   :  { %v2896_v18 = vpop.eup %2895  ;;  %984 = vst.msk [vmem:[#allocation2 + $0x8] sm:$0x30] %vm538_vm5, %v982_v62 }
0x1539   :  { %1085 = vrot.lane.b32.xlu1 %v2896_v18, %s3096_s3 }
0x153a   :  { %2804 = vmatpush3.bf16.msra.mxu0 %v3403_v21 }
0x153b   :  { %2811 = vmatprep.subr.bf16.mxu0 %v3092_v0  ;;  %v3429_v41 = vpop.permute.xlu0 %1279 }
0x153d   :  { %535 = vrot.lane.b32.xlu1 %v3317_v28, %s3096_s3  ;;  %v1100_v28 = vld [vmem:[#allocation9] sm:$0xff] }
0x153e   :  { %v2779_v24 = vpack.c.bf16 %v1101_v23, %v1100_v28 }
0x1540   :  { %2780 = vmatprep.subr.bf16.mxu1 %v2779_v24 }
0x1541   :  { %868 = vrot.lane.b32.xlu1 %v3366_v35, %s3096_s3  ;;  %2782 = vmatpush3.bf16.msra.mxu1 %v2779_v24 }
0x1542   :  { %2784 = vmatprep.subr.bf16.mxu1 %v2783_v27 }
0x1545   :  { %2786 = vmatpush3.bf16.msra.mxu1 %v2783_v27 }
0x1546   :  { %2793 = vmatprep.subr.bf16.mxu1 %v3092_v0 }
0x15ab   :  { %v1086_v31 = vpop.permute.xlu1 %1085 }
0x15ac   :  { %v1088_v34 = vmul.f32 %v1086_v31, %v1083_v29 }
0x15ae   :  { %v1092_v35 = vadd.f32 %v1091_v33, %v1088_v34 }
0x15af   :  { %v536_v36 = vpop.permute.xlu1 %535 }
0x15b0   :  { %539 = vst.msk [vmem:[#allocation2] sm:$0x30] %vm538_vm5, %v536_v36  ;;  %1094 = vrot.lane.b32.xlu1 %v1092_v35, %s3096_s3 }
0x15b3   :  { %v869_v37 = vpop.permute.xlu1 %868 }
0x15b4   :  { %871 = vst.msk [vmem:[#allocation2 + $0x8] sm:$0xc] %vm424_vm3, %v869_v37 }
0x15b7   :  { %v1098_v38 = vld [vmem:[#allocation2] sm:$0xff] }
0x15b8   :  { %2632 = vmatprep.mubr.msk.f32.mxu1 %vm119_vm1, %v1098_v38 }
0x1608   :  { %v1263_v39 = vpop.f32.mrb[10].mxu0 }
0x1609   :  { %v2645_v40 = vpop.f32.mrb[11].mxu0  ;;  %v1282_v42 = vadd.f32 %v3429_v41, %v1263_v39 }
0x160b   :  { %1284 = vrot.lane.b32.xlu1 %v1282_v42, %s3095_s28 }
0x1622   :  { %v1095_v43 = vpop.permute.xlu1 %1094 }
0x1623   :  { %1097 = vst.msk [vmem:[#allocation2 + $0x8] sm:$0xc0] %vm652_vm4, %v1095_v43 }
0x162a   :  { %v1099_v44 = vld [vmem:[#allocation2 + $0x8] sm:$0xff] }
0x162b   :  { %2633 = vmatmul.mubr.msk.f32.vlgmr.msra.gmra.mrb[8].mxu1 %vm119_vm1, %v1099_v44 }
0x162c   :  { %2795 = vmatpush3.bf16.msra.mxu1 %v3400_v22  ;;  %2654 = vmatprep.mubr.msk.f32.mxu1 %vm3093_vm0, %v3094_v1 }
0x162d   :  { %2796 = vmatprep.subr.bf16.mxu1 %v3092_v0 }
0x1630   :  { %2798 = vmatpush3.bf16.msra.mxu1 %v3403_v21 }
0x1631   :  { %2805 = vmatprep.subr.bf16.mxu1 %v3092_v0 }
0x167d   :  { %v1285_v54 = vpop.permute.xlu1 %1284 }
0x16fe   :  { %v2634_v46 = vpop.f32.mrb[8].mxu1 }
0x16ff   :  { %v3444_v47 = vadd.f32 %v2634_v46, %v2414_v45  ;;  %v1188_v48 = vpop.f32.mrb[9].mxu1 }
0x1700   :  { %v3446_v49 = vadd.f32 %v2414_v45, %v1188_v48 }
0x1702   :  { %v1267_v50 = vadd.f32 %v1263_v39, %v3446_v49 }
0x1704   :  { %v2417_v52 = vmul.f32 -1.442695, %v1267_v50 }
0x1706   :  { %2897 = vpow2.f32 %v2417_v52 }
0x1710   :  { %v2898_v53 = vpop.eup %2897 }
0x1711   :  { %v1271_v25 = vadd.f32 1.0, %v2898_v53 }
0x1713   :  { %2899 = vrcp.f32 %v1271_v25 }
0x171d   :  { %v2900_v55 = vpop.eup %2899 }
0x171e   :  { %v1287_v56 = vmul.f32 %v2900_v55, %v1285_v54  ;;  %v1294_v60 = vsub.f32 1.0, %v2900_v55  ;;  %v1300_v63 = vmul.f32 0.0, %v2900_v55 }
0x1720   :  { %1289 = vrot.lane.b32.xlu0 %v1287_v56, %s3095_s28 }
0x1792   :  { %v1290_v57 = vpop.permute.xlu0 %1289 }
0x1793   :  { %v1292_v58 = vadd.f32 %v1290_v57, %v3446_v49 }
0x1795   :  { %2901 = vtanh.f32 %v1292_v58 }
0x179f   :  { %v2902_v59 = vpop.eup %2901 }
0x17a0   :  { %1296 = vrot.lane.b32.xlu1 %v2902_v59, %s3096_s3 }
0x1812   :  { %v1297_v61 = vpop.permute.xlu1 %1296 }
0x1813   :  { %v1299_v2 = vmul.f32 %v1297_v61, %v1294_v60 }
0x1815   :  { %v3452_v3 = vadd.f32 %v1300_v63, %v1299_v2 }
0x1817   :  { %1342 = vrot.lane.b32.xlu0 %v3452_v3, %s3096_s3  ;;  %v1445_v20 = vrot.slane %v3452_v3, 6 }
0x1889   :  { %v1343_v4 = vpop.permute.xlu0 %1342 }
0x188a   :  { %2655 = vmatmul.mubr.msk.f32.vlgmr.msra.gmra.mrb[10].mxu1 %vm119_vm1, %v1343_v4 }
0x188b   :  { %2807 = vmatpush3.bf16.msra.mxu1 %v3400_v22  ;;  %2676 = vmatprep.mubr.msk.f32.mxu1 %vm3093_vm0, %v3094_v1 }
0x188c   :  { %2808 = vmatprep.subr.bf16.mxu1 %v3092_v0 }
0x188f   :  { %2810 = vmatpush3.bf16.msra.mxu1 %v3403_v21 }
0x1890   :  { %2817 = vmatprep.subr.bf16.mxu1 %v3092_v0 }
0x195d   :  { %v1412_v5 = vpop.f32.mrb[10].mxu1 }
0x195e   :  { %v1426_v6 = vadd.f32 %v1412_v5, %v3429_v41  ;;  %v2656_v7 = vpop.f32.mrb[11].mxu1  ;;  %v1417_v10 = vrot.slane %v1412_v5, 6 }
0x1960   :  { %v1428_v8 = vrot.slane %v1426_v6, 6  ;;  %v1419_v11 = vadd.f32 %v1417_v10, %v3446_v49 }
0x1962   :  { %1429 = vrot.lane.b32.xlu1 %v1428_v8, %s3095_s28  ;;  %v2420_v12 = vmul.f32 -1.442695, %v1419_v11 }
0x1964   :  { %2903 = vpow2.f32 %v2420_v12 }
0x196e   :  { %v2904_v17 = vpop.eup %2903 }
0x196f   :  { %v1423_v13 = vadd.f32 1.0, %v2904_v17 }
0x1971   :  { %2905 = vrcp.f32 %v1423_v13 }
0x197b   :  { %v2906_v14 = vpop.eup %2905 }
0x197c   :  { %v1439_v9 = vsub.f32 1.0, %v2906_v14  ;;  %v1447_v24 = vmul.f32 %v2906_v14, %v1445_v20 }
0x19d4   :  { %v1430_v16 = vpop.permute.xlu1 %1429 }
0x19d5   :  { %v1432_v62 = vmul.f32 %v2906_v14, %v1430_v16 }
0x19d7   :  { %1434 = vrot.lane.b32.xlu0 %v1432_v62, %s3095_s28 }
0x1a49   :  { %v1435_v18 = vpop.permute.xlu0 %1434 }
0x1a4a   :  { %v1437_v51 = vadd.f32 %v1435_v18, %v3446_v49 }
0x1a4c   :  { %2907 = vtanh.f32 %v1437_v51 }
0x1a56   :  { %v2908_v19 = vpop.eup %2907 }
0x1a57   :  { %1441 = vrot.lane.b32.xlu1 %v2908_v19, %s3096_s3 }
0x1ac9   :  { %v1442_v28 = vpop.permute.xlu1 %1441 }
0x1aca   :  { %v1444_v23 = vmul.f32 %v1442_v28, %v1439_v9 }
0x1acc   :  { %v3470_v15 = vadd.f32 %v1447_v24, %v1444_v23 }
0x1ace   :  { %v1490_v26 = vrot.slane %v3470_v15, 2  ;;  %v1594_v46 = vrot.slane %v3470_v15, 6 }
0x1ad0   :  { %1491 = vrot.lane.b32.xlu0 %v1490_v26, %s3096_s3 }
0x1b42   :  { %v1492_v27 = vpop.permute.xlu0 %1491 }
0x1b43   :  { %2666 = vmatmul.mubr.msk.f32.vlgmr.msra.gmra.mrb[12].mxu0 %vm119_vm1, %v1492_v27 }
0x1b44   :  { %2813 = vmatpush3.bf16.msra.mxu0 %v3400_v22  ;;  %2687 = vmatprep.mubr.msk.f32.mxu0 %vm3093_vm0, %v3094_v1 }
0x1b45   :  { %2814 = vmatprep.subr.bf16.mxu0 %v3092_v0 }
0x1b48   :  { %2816 = vmatpush3.bf16.msra.mxu0 %v3403_v21 }
0x1b49   :  { %2823 = vmatprep.subr.bf16.mxu0 %v3092_v0 }
0x1c16   :  { %v1561_v29 = vpop.f32.mrb[12].mxu0 }
0x1c17   :  { %v1575_v30 = vadd.f32 %v1561_v29, %v3429_v41  ;;  %v2667_v31 = vpop.f32.mrb[13].mxu0  ;;  %v1566_v33 = vrot.slane %v1561_v29, 4 }
0x1c19   :  { %v1577_v32 = vrot.slane %v1575_v30, 4  ;;  %v1568_v34 = vadd.f32 %v1566_v33, %v3446_v49 }
0x1c1b   :  { %1578 = vrot.lane.b32.xlu1 %v1577_v32, %s3095_s28  ;;  %v2422_v35 = vmul.f32 -1.442695, %v1568_v34 }
0x1c1d   :  { %2909 = vpow2.f32 %v2422_v35 }
0x1c27   :  { %v2910_v36 = vpop.eup %2909 }
0x1c28   :  { %v1572_v37 = vadd.f32 1.0, %v2910_v36 }
0x1c2a   :  { %2911 = vrcp.f32 %v1572_v37 }
0x1c34   :  { %v2912_v38 = vpop.eup %2911 }
0x1c35   :  { %v1588_v45 = vsub.f32 1.0, %v2912_v38  ;;  %v1596_v50 = vmul.f32 %v2912_v38, %v1594_v46 }
0x1c8d   :  { %v1579_v39 = vpop.permute.xlu1 %1578 }
0x1c8e   :  { %v1581_v40 = vmul.f32 %v2912_v38, %v1579_v39 }
0x1c90   :  { %1583 = vrot.lane.b32.xlu0 %v1581_v40, %s3095_s28 }
0x1d02   :  { %v1584_v42 = vpop.permute.xlu0 %1583 }
0x1d03   :  { %v1586_v43 = vadd.f32 %v1584_v42, %v3446_v49 }
0x1d05   :  { %2913 = vtanh.f32 %v1586_v43 }
0x1d0f   :  { %v2914_v44 = vpop.eup %2913 }
0x1d10   :  { %1590 = vrot.lane.b32.xlu1 %v2914_v44, %s3096_s3 }
0x1d82   :  { %v1591_v48 = vpop.permute.xlu1 %1590 }
0x1d83   :  { %v1593_v52 = vmul.f32 %v1591_v48, %v1588_v45 }
0x1d85   :  { %v3488_v53 = vadd.f32 %v1596_v50, %v1593_v52 }
0x1d87   :  { %v1638_v25 = vrot.slane %v3488_v53, 4  ;;  %v1742_v12 = vrot.slane %v3488_v53, 6 }
0x1d89   :  { %1639 = vrot.lane.b32.xlu0 %v1638_v25, %s3096_s3 }
0x1dfb   :  { %v1640_v54 = vpop.permute.xlu0 %1639 }
0x1dfc   :  { %2677 = vmatmul.mubr.msk.f32.vlgmr.msra.gmra.mrb[12].mxu1 %vm119_vm1, %v1640_v54 }
0x1dfd   :  { %2819 = vmatpush3.bf16.msra.mxu1 %v3400_v22  ;;  %2698 = vmatprep.mubr.msk.f32.mxu1 %vm3093_vm0, %v3094_v1 }
0x1dfe   :  { %2820 = vmatprep.subr.bf16.mxu1 %v3092_v0 }
0x1e01   :  { %2822 = vmatpush3.bf16.msra.mxu1 %v3403_v21 }
0x1e02   :  { %2829 = vmatprep.subr.bf16.mxu1 %v3092_v0 }
0x1ecf   :  { %v1709_v55 = vpop.f32.mrb[12].mxu1 }
0x1ed0   :  { %v1723_v56 = vadd.f32 %v1709_v55, %v3429_v41  ;;  %v2678_v57 = vpop.f32.mrb[13].mxu1  ;;  %v1714_v59 = vrot.slane %v1709_v55, 2 }
0x1ed2   :  { %v1725_v58 = vrot.slane %v1723_v56, 2  ;;  %v1716_v60 = vadd.f32 %v1714_v59, %v3446_v49 }
0x1ed4   :  { %1726 = vrot.lane.b32.xlu1 %v1725_v58, %s3095_s28  ;;  %v2424_v61 = vmul.f32 -1.442695, %v1716_v60 }
0x1ed6   :  { %2915 = vpow2.f32 %v2424_v61 }
0x1ee0   :  { %v2916_v63 = vpop.eup %2915 }
0x1ee1   :  { %v1720_v2 = vadd.f32 1.0, %v2916_v63 }
0x1ee3   :  { %2917 = vrcp.f32 %v1720_v2 }
0x1eed   :  { %v2918_v4 = vpop.eup %2917 }
0x1eee   :  { %v1736_v11 = vsub.f32 1.0, %v2918_v4  ;;  %v1744_v13 = vmul.f32 %v2918_v4, %v1742_v12 }
0x1f46   :  { %v1727_v5 = vpop.permute.xlu1 %1726 }
0x1f47   :  { %v1729_v6 = vmul.f32 %v2918_v4, %v1727_v5 }
0x1f49   :  { %1731 = vrot.lane.b32.xlu0 %v1729_v6, %s3095_s28 }
0x1fbb   :  { %v1732_v7 = vpop.permute.xlu0 %1731 }
0x1fbc   :  { %v1734_v8 = vadd.f32 %v1732_v7, %v3446_v49 }
0x1fbe   :  { %2919 = vtanh.f32 %v1734_v8 }
0x1fc8   :  { %v2920_v10 = vpop.eup %2919 }
0x1fc9   :  { %1738 = vrot.lane.b32.xlu1 %v2920_v10, %s3096_s3 }
0x203b   :  { %v1739_v17 = vpop.permute.xlu1 %1738 }
0x203c   :  { %v1741_v14 = vmul.f32 %v1739_v17, %v1736_v11 }
0x203e   :  { %v3506_v16 = vadd.f32 %v1744_v13, %v1741_v14 }
0x2040   :  { %v1788_v62 = vrot.slane %v3506_v16, 6 }
0x2042   :  { %1789 = vrot.lane.b32.xlu0 %v1788_v62, %s3096_s3 }
0x20b4   :  { %v1790_v18 = vpop.permute.xlu0 %1789 }
0x20b5   :  { %2688 = vmatmul.mubr.msk.f32.vlgmr.msra.gmra.mrb[14].mxu0 %vm119_vm1, %v1790_v18 }
0x20b6   :  { %2825 = vmatpush3.bf16.msra.mxu0 %v3400_v22  ;;  %2709 = vmatprep.mubr.msk.f32.mxu0 %vm3093_vm0, %v3094_v1 }
0x20b7   :  { %2826 = vmatprep.subr.bf16.mxu0 %v3092_v0 }
0x20ba   :  { %2828 = vmatpush3.bf16.msra.mxu0 %v3403_v21 }
0x2188   :  { %v1859_v49 = vpop.f32.mrb[14].mxu0 }
0x2189   :  { %v1870_v51 = vadd.f32 %v1859_v49, %v3429_v41  ;;  %v2689_v19 = vpop.f32.mrb[15].mxu0  ;;  %v1863_v9 = vadd.f32 %v1859_v49, %v3444_v47 }
0x218b   :  { %1872 = vrot.lane.b32.xlu1 %v1870_v51, %s3095_s28  ;;  %v2426_v20 = vmul.f32 -1.442695, %v1863_v9 }
0x218d   :  { %2921 = vpow2.f32 %v2426_v20 }
0x2197   :  { %v2922_v28 = vpop.eup %2921 }
0x2198   :  { %v1867_v23 = vadd.f32 1.0, %v2922_v28 }
0x219a   :  { %2923 = vrcp.f32 %v1867_v23 }
0x21a4   :  { %v2924_v24 = vpop.eup %2923 }
0x21a5   :  { %v1882_v32 = vsub.f32 1.0, %v2924_v24  ;;  %v1889_v34 = vmul.f32 %v2924_v24, %v1788_v62 }
0x21fd   :  { %v1873_v26 = vpop.permute.xlu1 %1872 }
0x21fe   :  { %v1875_v27 = vmul.f32 %v2924_v24, %v1873_v26 }
0x2200   :  { %1877 = vrot.lane.b32.xlu0 %v1875_v27, %s3095_s28 }
0x2272   :  { %v1878_v29 = vpop.permute.xlu0 %1877 }
0x2273   :  { %v1880_v30 = vadd.f32 %v1878_v29, %v3444_v47 }
0x2275   :  { %2925 = vtanh.f32 %v1880_v30 }
0x227f   :  { %v2926_v31 = vpop.eup %2925 }
0x2280   :  { %1884 = vrot.lane.b32.xlu1 %v2926_v31, %s3096_s3 }
0x22f2   :  { %v1885_v33 = vpop.permute.xlu1 %1884 }
0x22f3   :  { %v1887_v35 = vmul.f32 %v1885_v33, %v1882_v32 }
0x22f5   :  { %v3522_v36 = vadd.f32 %v1889_v34, %v1887_v35  ;;  %v3097_v34 = vmov 1966171168  }
0x22f6   :  { %v1304_v35 = vunpack.c.l.s4 %v3097_v34 }
0x22f7   :  { %1930 = vrot.lane.b32.xlu0 %v3522_v36, %s3096_s3  ;;  %v2033_v54 = vrot.slane %v3522_v36, 6 }
0x2369   :  { %v1931_v37 = vpop.permute.xlu0 %1930 }
0x236a   :  { %2699 = vmatmul.mubr.msk.f32.vlgmr.msra.gmra.mrb[14].mxu1 %vm119_vm1, %v1931_v37  ;;  %v1306_v37 = vlaneseq }
0x236b   :  { %2831 = vmatpush3.bf16.msra.mxu1 %v3400_v22  ;;  %2720 = vmatprep.mubr.msk.f32.mxu1 %vm3093_vm0, %v3094_v1 }
0x236c   :  { %2832 = vmatprep.subr.bf16.mxu1 %v3092_v0 }
0x236f   :  { %2834 = vmatpush3.bf16.msra.mxu1 %v3403_v21 }
0x243d   :  { %v2000_v38 = vpop.f32.mrb[14].mxu1 }
0x243e   :  { %v2014_v39 = vadd.f32 %v2000_v38, %v3429_v41  ;;  %v2700_v40 = vpop.f32.mrb[15].mxu1  ;;  %v2005_v43 = vrot.slane %v2000_v38, 6 }
0x243f   :  { %v1307_v40 = vshrl.u32 %v1306_v37, 7 }
0x2440   :  { %v2016_v42 = vrot.slane %v2014_v39, 6  ;;  %v2007_v44 = vadd.f32 %v2005_v43, %v3444_v47  ;;  %v1305_v39 = vunpack.c.0.s8 %v1304_v35 }
0x2442   :  { %2017 = vrot.lane.b32.xlu1 %v2016_v42, %s3095_s28  ;;  %v2428_v45 = vmul.f32 -1.442695, %v2007_v44  ;;  %v3559_v42 = vsub.s32 %v1305_v39, %v1307_v40 }
0x2444   :  { %2927 = vpow2.f32 %v2428_v45  ;;  %v1456_v43 = vrot.slane %v3470_v15, %v3559_v42 }
0x244e   :  { %v2928_v22 = vpop.eup %2927 }
0x244f   :  { %v2011_v46 = vadd.f32 1.0, %v2928_v22 }
0x2451   :  { %2929 = vrcp.f32 %v2011_v46  ;;  %v3568_v46 = vsub.s32 0, %v1307_v40 }
0x245b   :  { %v2930_v1 = vpop.eup %2929 }
0x245c   :  { %v2027_v25 = vsub.f32 1.0, %v2930_v1  ;;  %v2035_v57 = vmul.f32 %v2930_v1, %v2033_v54  ;;  %v1898_v54 = vrot.slane %v3522_v36, %v3559_v42 }
0x24b4   :  { %v2018_v48 = vpop.permute.xlu1 %2017 }
0x24b5   :  { %v2020_v0 = vmul.f32 %v2930_v1, %v2018_v48  ;;  %v1599_v1 = vcombine.high %v3488_v53, %v3488_v53  ;;  %v1747_v48 = vcombine.high %v3506_v16, %v3506_v16 }
0x24b7   :  { %2022 = vrot.lane.b32.xlu0 %v2020_v0, %s3095_s28  ;;  %v1754_v15 = vrot.slane %v1747_v48, %v3559_v42 }
0x24b9   :  { %v1762_v16 = vrot.slane %v1754_v15, %v3559_v42 }
0x2529   :  { %v2023_v21 = vpop.permute.xlu0 %2022 }
0x252a   :  { %v2025_v50 = vadd.f32 %v2023_v21, %v3444_v47 }
0x252c   :  { %2931 = vtanh.f32 %v2025_v50 }
0x2536   :  { %v2932_v52 = vpop.eup %2931 }
0x2537   :  { %2029 = vrot.lane.b32.xlu1 %v2932_v52, %s3096_s3  ;;  %v1606_v52 = vrot.slane %v1599_v1, %v3559_v42 }
0x25a9   :  { %v2030_v55 = vpop.permute.xlu1 %2029 }
0x25aa   :  { %v2032_v56 = vmul.f32 %v2030_v55, %v2027_v25  ;;  %v1614_v25 = vrot.slane %v1606_v52, %v3559_v42 }
0x25ac   :  { %v3539_v58 = vadd.f32 %v2035_v57, %v2032_v56  ;;  %v1625_v56 = vrot.slane %v1614_v25, %v3568_v46  ;;  %v1770_v57 = vcombine.high %v1762_v16, %v1762_v16 }
0x25ae   :  { %v2078_v59 = vrot.slane %v3539_v58, 2  ;;  %v2182_v49 = vrot.slane %v3539_v58, 6  ;;  %v2044_v55 = vrot.slane %v3539_v58, %v3559_v42 }
0x25b0   :  { %2079 = vrot.lane.b32.xlu0 %v2078_v59, %s3096_s3 }
0x2622   :  { %v2080_v60 = vpop.permute.xlu0 %2079 }
0x2623   :  { %2710 = vmatmul.mubr.msk.f32.vlgmr.msra.gmra.mrb[16].mxu0 %vm119_vm1, %v2080_v60  ;;  %v1775_v60 = vrot.slane %v1770_v57, %v3568_v46 }
0x26f6   :  { %v2149_v61 = vpop.f32.mrb[16].mxu0 }
0x26f7   :  { %v2163_v63 = vadd.f32 %v2149_v61, %v3429_v41  ;;  %v2711_v2 = vpop.f32.mrb[17].mxu0  ;;  %v2154_v5 = vrot.slane %v2149_v61, 4  ;;  %v1906_v61 = vrot.slane %v1898_v54, %v3559_v42 }
0x26f9   :  { %v2165_v4 = vrot.slane %v2163_v63, 4  ;;  %v2156_v6 = vadd.f32 %v2154_v5, %v3444_v47  ;;  %v2052_v63 = vrot.slane %v2044_v55, %v3559_v42  ;;  %v1917_v36 = vrot.slane %v1906_v61, %v3568_v46 }
0x26fb   :  { %2166 = vrot.lane.b32.xlu1 %v2165_v4, %s3095_s28  ;;  %v2430_v7 = vmul.f32 -1.442695, %v2156_v6  ;;  %v2060_v2 = vcombine.high %v2052_v63, %v2052_v63 }
0x26fd   :  { %2933 = vpow2.f32 %v2430_v7  ;;  %v2065_v4 = vrot.slane %v2060_v2, %v3568_v46 }
0x2707   :  { %v2934_v8 = vpop.eup %2933 }
0x2708   :  { %v2160_v10 = vadd.f32 1.0, %v2934_v8 }
0x270a   :  { %2935 = vrcp.f32 %v2160_v10 }
0x2714   :  { %v2936_v11 = vpop.eup %2935 }
0x2715   :  { %v2176_v18 = vsub.f32 1.0, %v2936_v11  ;;  %v2184_v19 = vmul.f32 %v2936_v11, %v2182_v49 }
0x276d   :  { %v2167_v12 = vpop.permute.xlu1 %2166 }
0x276e   :  { %v2169_v17 = vmul.f32 %v2936_v11, %v2167_v12 }
0x2770   :  { %2171 = vrot.lane.b32.xlu0 %v2169_v17, %s3095_s28  ;;  %v1457_v17 = vcombine.high %v1456_v43, %v1456_v43 }
0x27e2   :  { %v2172_v13 = vpop.permute.xlu0 %2171 }
0x27e3   :  { %v2174_v14 = vadd.f32 %v2172_v13, %v3444_v47 }
0x27e5   :  { %2937 = vtanh.f32 %v2174_v14 }
0x27ef   :  { %v2938_v62 = vpop.eup %2937 }
0x27f0   :  { %2178 = vrot.lane.b32.xlu1 %v2938_v62, %s3096_s3  ;;  %v1471_v62 = vrot.slane %v1457_v17, %v3559_v42 }
0x2862   :  { %v2179_v51 = vpop.permute.xlu1 %2178 }
0x2863   :  { %v2181_v9 = vmul.f32 %v2179_v51, %v2176_v18  ;;  %v1473_v51 = vcombine.high %v1471_v62, %v1471_v62 }
0x2865   :  { %v3551_v20 = vadd.f32 %v2184_v19, %v2181_v9  ;;  %v1607_v19 = vcombine.high %v1606_v52, %v1606_v52  ;;  %v1755_v9 = vcombine.high %v1754_v15, %v1754_v15 }
0x2867   :  { %v2226_v28 = vrot.slane %v3551_v20, 4  ;;  %v2187_v59 = vcombine.high %v3551_v20, %v3551_v20  ;;  %v2330_v1 = vrot.slane %v3551_v20, 6 }
0x2869   :  { %2227 = vrot.lane.b32.xlu0 %v2226_v28, %s3096_s3  ;;  %v2194_v58 = vrot.slane %v2187_v59, %v3559_v42 }
0x286b   :  { %v2202_v5 = vrot.slane %v2194_v58, %v3559_v42  ;;  %v2195_v40 = vcombine.high %v2194_v58, %v2194_v58 }
0x286d   :  { %v2213_v6 = vrot.slane %v2202_v5, %v3568_v46 }
0x28db   :  { %v2228_v23 = vpop.permute.xlu0 %2227 }
0x28dc   :  { %2721 = vmatmul.mubr.msk.f32.vlgmr.msra.gmra.mrb[16].mxu1 %vm119_vm1, %v2228_v23  ;;  %v1481_v23 = vrot.slane %v1473_v51, %v3568_v46 }
0x29af   :  { %v2297_v24 = vpop.f32.mrb[16].mxu1 }
0x29b0   :  { %v2311_v26 = vadd.f32 %v2297_v24, %v3429_v41  ;;  %v2722_v27 = vpop.f32.mrb[17].mxu1  ;;  %v2302_v30 = vrot.slane %v2297_v24, 2  ;;  %v1309_v41 = vrot.slane %v3452_v3, %v3559_v42  ;;  %v1464_v3 = vrot.slane %v1456_v43, %v3559_v42 }
0x29b1   :  { %v1621_v24 = vrot.slane %v1607_v19, %v3559_v42  ;;  %v2209_v43 = vrot.slane %v2195_v40, %v3559_v42 }
0x29b2   :  { %v2313_v29 = vrot.slane %v2311_v26, 2  ;;  %v2304_v31 = vadd.f32 %v2302_v30, %v3444_v47  ;;  %v1317_v22 = vrot.slane %v1309_v41, %v3559_v42  ;;  %v1472_v50 = vcombine.high %v1464_v3, %v1464_v3 }
0x29b3   :  { %v1310_v12 = vcombine.high %v1309_v41, %v1309_v41  ;;  %v1769_v26 = vrot.slane %v1755_v9, %v3559_v42 }
0x29b4   :  { %2314 = vrot.lane.b32.xlu1 %v2313_v29, %s3095_s28  ;;  %v2432_v32 = vmul.f32 -1.442695, %v2304_v31  ;;  %v1328_v21 = vrot.slane %v1317_v22, %v3568_v46  ;;  %v1477_v53 = vrot.slane %v1472_v50, %v3568_v46  ;;  %v1629_v29 = vrot.slane %v1621_v24, %v3568_v46 }
0x29b5   :  { %v1324_v14 = vrot.slane %v1310_v12, %v3559_v42  ;;  %v1771_v30 = vcombine.high %v1769_v26, %v1769_v26  ;;  %v1899_v31 = vcombine.high %v1898_v54, %v1898_v54 }
0x29b6   :  { %2939 = vpow2.f32 %v2432_v32  ;;  %v2045_v32 = vcombine.high %v2044_v55, %v2044_v55 }
0x29b7   :  { %v1332_v49 = vrot.slane %v1324_v14, %v3568_v46  ;;  %v1779_v34 = vrot.slane %v1771_v30, %v3568_v46  ;;  %v1913_v35 = vrot.slane %v1899_v31, %v3559_v42 }
0x29b8   :  { %v2059_v37 = vrot.slane %v2045_v32, %v3559_v42 }
0x29ba   :  { %v2061_v39 = vcombine.high %v2059_v37, %v2059_v37 }
0x29bc   :  { %v2069_v41 = vrot.slane %v2061_v39, %v3568_v46 }
0x29c0   :  { %v2940_v33 = vpop.eup %2939 }
0x29c1   :  { %v2308_v38 = vadd.f32 1.0, %v2940_v33 }
0x29c3   :  { %2941 = vrcp.f32 %v2308_v38  ;;  %v1921_v38 = vrot.slane %v1913_v35, %v3568_v46 }
0x29cd   :  { %v3565_v44 = vpop.eup %2941 }
0x29ce   :  { %v2324_v22 = vsub.f32 1.0, %v3565_v44 }
0x2a26   :  { %v2315_v45 = vpop.permute.xlu1 %2314 }
0x2a27   :  { %v2317_v0 = vmul.f32 %v3565_v44, %v2315_v45  ;;  %v2217_v45 = vrot.slane %v2209_v43, %v3568_v46 }
0x2a29   :  { %2319 = vrot.lane.b32.xlu0 %v2317_v0, %s3095_s28  ;;  %v2332_v0 = vmul.f32 %v3565_v44, %v2330_v1 }
0x2a2d   :  { %1333 = vrot.lane.b32.xlu0 %v1328_v21, %s3096_s3 }
0x2a31   :  { %1482 = vrot.lane.b32.xlu0 %v1477_v53, %s3096_s3 }
0x2a35   :  { %1630 = vrot.lane.b32.xlu0 %v1625_v56, %s3096_s3 }
0x2a39   :  { %1780 = vrot.lane.b32.xlu0 %v1775_v60, %s3096_s3 }
0x2a3d   :  { %1922 = vrot.lane.b32.xlu0 %v1917_v36, %s3096_s3 }
0x2a41   :  { %2070 = vrot.lane.b32.xlu0 %v2065_v4, %s3096_s3 }
0x2a45   :  { %2218 = vrot.lane.b32.xlu0 %v2213_v6, %s3096_s3 }
0x2a9b   :  { %v2320_v7 = vpop.permute.xlu0 %2319 }
0x2a9c   :  { %v2322_v8 = vadd.f32 %v2320_v7, %v3444_v47 }
0x2a9e   :  { %2943 = vtanh.f32 %v2322_v8 }
0x2a9f   :  { %v1334_v10 = vpop.permute.xlu0 %1333 }
0x2aa0   :  { %1340 = vst.msk [vmem:[#allocation12] sm:$0x1] %vm1339_vm6, %v1334_v10 }
0x2aa3   :  { %v1483_v11 = vpop.permute.xlu0 %1482 }
0x2aa4   :  { %1488 = vst.msk [vmem:[#allocation12 + $0x1] sm:$0x1] %vm1339_vm6, %v1483_v11 }
0x2aa7   :  { %v1631_v13 = vpop.permute.xlu0 %1630 }
0x2aa8   :  { %v2944_v18 = vpop.eup %2943  ;;  %1636 = vst.msk [vmem:[#allocation12 + $0x2] sm:$0x1] %vm1339_vm6, %v1631_v13 }
0x2aa9   :  { %2326 = vrot.lane.b32.xlu1 %v2944_v18, %s3096_s3 }
0x2aab   :  { %v1781_v47 = vpop.permute.xlu0 %1780 }
0x2aac   :  { %1786 = vst.msk [vmem:[#allocation12 + $0x3] sm:$0x1] %vm1339_vm6, %v1781_v47 }
0x2aad   :  { %1335 = vrot.lane.b32.xlu1 %v1332_v49, %s3096_s3 }
0x2aaf   :  { %v1923_v28 = vpop.permute.xlu0 %1922 }
0x2ab0   :  { %1928 = vst.msk [vmem:[#allocation12 + $0x4] sm:$0x1] %vm1339_vm6, %v1923_v28 }
0x2ab1   :  { %1484 = vrot.lane.b32.xlu1 %v1481_v23, %s3096_s3 }
0x2ab3   :  { %v2071_v27 = vpop.permute.xlu0 %2070 }
0x2ab4   :  { %2076 = vst.msk [vmem:[#allocation12 + $0x5] sm:$0x1] %vm1339_vm6, %v2071_v27 }
0x2ab5   :  { %1632 = vrot.lane.b32.xlu1 %v1629_v29, %s3096_s3 }
0x2ab7   :  { %v2219_v33 = vpop.permute.xlu0 %2218 }
0x2ab8   :  { %2224 = vst.msk [vmem:[#allocation12 + $0x6] sm:$0x1] %vm1339_vm6, %v2219_v33 }
0x2ab9   :  { %1782 = vrot.lane.b32.xlu1 %v1779_v34, %s3096_s3 }
0x2abd   :  { %1924 = vrot.lane.b32.xlu1 %v1921_v38, %s3096_s3 }
0x2ac1   :  { %2072 = vrot.lane.b32.xlu1 %v2069_v41, %s3096_s3 }
0x2ac5   :  { %2220 = vrot.lane.b32.xlu1 %v2217_v45, %s3096_s3 }
0x2b1b   :  { %v2327_v48 = vpop.permute.xlu1 %2326 }
0x2b1c   :  { %v2329_v3 = vmul.f32 %v2327_v48, %v2324_v22 }
0x2b1e   :  { %v2333_v15 = vadd.f32 %v2332_v0, %v2329_v3 }
0x2b1f   :  { %v1336_v21 = vpop.permute.xlu1 %1335 }
0x2b20   :  { %v2335_v50 = vcombine.high %v2333_v15, %v2333_v15  ;;  %1341 = vst.msk [vmem:[#allocation12 + $0x8] sm:$0x1] %vm1339_vm6, %v1336_v21 }
0x2b22   :  { %v2342_v52 = vrot.slane %v2335_v50, %v3559_v42 }
0x2b23   :  { %v1485_v53 = vpop.permute.xlu1 %1484 }
0x2b24   :  { %v2343_v25 = vcombine.high %v2342_v52, %v2342_v52  ;;  %1489 = vst.msk [vmem:[#allocation12 + $0x9] sm:$0x1] %vm1339_vm6, %v1485_v53  ;;  %v2350_v16 = vrot.slane %v2342_v52, %v3559_v42 }
0x2b26   :  { %v2358_v54 = vcombine.high %v2350_v16, %v2350_v16  ;;  %v2357_v20 = vrot.slane %v2343_v25, %v3559_v42 }
0x2b27   :  { %v1633_v55 = vpop.permute.xlu1 %1632 }
0x2b28   :  { %1637 = vst.msk [vmem:[#allocation12 + $0xa] sm:$0x1] %vm1339_vm6, %v1633_v55  ;;  %v2363_v44 = vrot.slane %v2358_v54, %v3568_v46  ;;  %v2359_v56 = vcombine.high %v2357_v20, %v2357_v20 }
0x2b2a   :  { %2368 = vrot.lane.b32.xlu0 %v2363_v44, %s3096_s3  ;;  %v2367_v57 = vrot.slane %v2359_v56, %v3568_v46 }
0x2b2b   :  { %v1783_v59 = vpop.permute.xlu1 %1782 }
0x2b2c   :  { %1787 = vst.msk [vmem:[#allocation12 + $0xb] sm:$0x1] %vm1339_vm6, %v1783_v59  ;;  %2370 = vrot.lane.b32.xlu1 %v2367_v57, %s3096_s3 }
0x2b2f   :  { %v1925_v60 = vpop.permute.xlu1 %1924 }
0x2b30   :  { %1929 = vst.msk [vmem:[#allocation12 + $0xc] sm:$0x1] %vm1339_vm6, %v1925_v60 }
0x2b33   :  { %v2073_v61 = vpop.permute.xlu1 %2072 }
0x2b34   :  { %2077 = vst.msk [vmem:[#allocation12 + $0xd] sm:$0x1] %vm1339_vm6, %v2073_v61 }
0x2b37   :  { %v2221_v42 = vpop.permute.xlu1 %2220 }
0x2b38   :  { %2225 = vst.msk [vmem:[#allocation12 + $0xe] sm:$0x1] %vm1339_vm6, %v2221_v42 }
0x2b9c   :  { %v2369_v63 = vpop.permute.xlu0 %2368 }
0x2b9d   :  { %2374 = vst.msk [vmem:[#allocation12 + $0x7] sm:$0x1] %vm1339_vm6, %v2369_v63 }
0x2b9e   :  { %v2371_v46 = vpop.permute.xlu1 %2370 }
0x2b9f   :  { %2375 = vst.msk [vmem:[#allocation12 + $0xf] sm:$0x1] %vm1339_vm6, %v2371_v46 }
0x2ba0   :  { %3066 = shalt.err (!%p3063_p2)
}
0x2ba1   :  { %s3067_s15 = scalar_lea.hbm %s3678_s9, 256 }
0x2ba2   :  { %p3068_p3 = scmp.ne.s32.totalorder %s3678_s9, %s3067_s15  ;;  %p3071_p4 = scmp.lt.u32.totalorder %s3067_s15, %s3678_s9 }
0x2ba4   :  { %p3073_p5 = pnand %p3071_p4, %p3068_p3 }
0x2ba6   :  { %3076 = shalt.err (!%p3073_p5)
}
0x2ba7   :  { %2387 = dma.vmem_to_hbm [thread:$0]  %s2382_s1, 256, %s3678_s9, [#allocation5], %s3087_s21, %s3087_s21, %s3088_s22  }
0x2ba8   :  { %3083 = dma.done.wait [#allocation5], 256  }
0x2ba9   :  { %3084 = vsyncadd [#allocation5], 4294967040 }
0x2baa   :  { %2391 = vsyncpa [#allocation4], 1 }
0x2bab   :  { %2392 = vsyncpa [#allocation7], 1 }
0x2bac   :  { %2393 = vsyncpa [#allocation10], 1 }
0x2bad   :  { %2394 = vsyncpa [#allocation5], 1 }

</bundles_post_ra>
